<compile_context>
chip_gen: v5e
topology: v5e:2x2
jax: 0.10.0
libtpu: 0.0.40
codegen_flags: <defaults>
</compile_context>

<pallas_src>
import math
import functools

import jax
import jax.numpy as jnp
from jax.experimental import pallas as pl
from jax.experimental.pallas import tpu as pltpu


_INV_SQRT2 = 1.0 / math.sqrt(2.0)


def _vmem_capacity_bytes():
    try:
        return int(pltpu.get_tpu_info().vmem_capacity_bytes)
    except Exception:
        return 64 * 1024 * 1024          # conservative default (v7x per-TC)


_VMEM_CAP = _vmem_capacity_bytes()
if _VMEM_CAP >= 100 * 1024 * 1024:       # v5e / v6e: 128 MiB physical VMEM
    _TM_TARGET = 512
    _VMEM_LIMIT_BYTES = 96 * 1024 * 1024
else:                                     # v7x: 64 MiB per TensorCore
    _TM_TARGET = 256
    _VMEM_LIMIT_BYTES = 40 * 1024 * 1024
_TN_TARGET = 512
_TK_TARGET = 512


def _round_up(v, m):
    return ((v + m - 1) // m) * m


def _pick_tile(dim, target, unit):
    """Largest multiple of `unit` <= target that evenly divides `dim`; else full dim."""
    if dim % unit != 0:
        return dim
    t = min(target, dim)
    t -= t % unit
    while t > 0 and dim % t != 0:
        t -= unit
    return t if t > 0 else dim


def _pad_rows(x, m_pad):
    m = x.shape[0]
    if m_pad == m:
        return x
    return jnp.pad(x, ((0, m_pad - m), (0, 0)))


def _gelu(y):
    # exact (erf) GELU -- matches torch.nn.functional.gelu default
    return 0.5 * y * (1.0 + jax.lax.erf(y * _INV_SQRT2))


def _resident_fits(tm, K, N, w_bytes, has_residual=False):
    """Does a weight-resident schedule fit the per-kernel VMEM budget?"""
    bufs = 3 if has_residual else 2       # x tile, out tile (+ residual tile)
    need = w_bytes + 2 * tm * K * 4 + 2 * bufs * tm * N * 4 + (2 << 20)
    return need <= _VMEM_LIMIT_BYTES


# ----------------------------------------------------------------------------
# Kernel: fused LayerNorm -> matmul (+ optional GELU)
# ----------------------------------------------------------------------------

def _ln_matmul_kernel(x_ref, g_ref, be_ref, w_ref, b_ref, o_ref, *, gelu):
    x = x_ref[...].astype(jnp.float32)
    mu = jnp.mean(x, axis=-1, keepdims=True)
    var = jnp.mean((x - mu) ** 2, axis=-1, keepdims=True)
    h = (x - mu) * jax.lax.rsqrt(var + 1e-5)          # eps=1e-5 (torch default)
    h = h * g_ref[...] + be_ref[...]
    y = jnp.dot(h.astype(jnp.bfloat16), w_ref[...],
                preferred_element_type=jnp.float32) + b_ref[...]
    if gelu:
        y = _gelu(y)
    o_ref[...] = y.astype(o_ref.dtype)


def ln_matmul(x, gamma, beta, w, b, gelu=False):
    """y = [gelu](LayerNorm(x) @ w + b). x:(M,K) f32, w:(K,N) bf16 -> (M,N) f32.
    K kept whole (LN needs the full feature row)."""
    M, K = x.shape
    N = w.shape[1]
    tm = min(_TM_TARGET, _round_up(M, 8))
    m_pad = _round_up(M, tm)
    xp = _pad_rows(x, m_pad)
    kern = functools.partial(_ln_matmul_kernel, gelu=gelu)
    cost = pl.CostEstimate(
        flops=2 * m_pad * N * K + 10 * m_pad * K,
        transcendentals=(m_pad * N) if gelu else 0,
        bytes_accessed=4 * (m_pad * K + m_pad * N) + 2 * K * N,
    )
    w_bytes = K * N * w.dtype.itemsize

    if _resident_fits(tm, K, N, w_bytes):
        # Weight stays resident in VMEM: single grid axis over row tiles.
        grid = (m_pad // tm,)
        in_specs = [
            pl.BlockSpec((tm, K), lambda i: (i, 0)),
            pl.BlockSpec((1, K), lambda i: (0, 0)),
            pl.BlockSpec((1, K), lambda i: (0, 0)),
            pl.BlockSpec((K, N), lambda i: (0, 0)),     # constant block index
            pl.BlockSpec((1, N), lambda i: (0, 0)),
        ]
        out_specs = pl.BlockSpec((tm, N), lambda i: (i, 0))
        dims = ("parallel",)
    else:
        # Fallback: tile N; weight column block varies slowest (j outermost)
        # so each weight column block is fetched once.  LN recomputed per j.
        tn = _pick_tile(N, _TN_TARGET, 128)
        grid = (N // tn, m_pad // tm)
        in_specs = [
            pl.BlockSpec((tm, K), lambda j, i: (i, 0)),
            pl.BlockSpec((1, K), lambda j, i: (0, 0)),
            pl.BlockSpec((1, K), lambda j, i: (0, 0)),
            pl.BlockSpec((K, tn), lambda j, i: (0, j)),
            pl.BlockSpec((1, tn), lambda j, i: (0, j)),
        ]
        out_specs = pl.BlockSpec((tm, tn), lambda j, i: (i, j))
        dims = ("parallel", "parallel")

    out = pl.pallas_call(
        kern,
        out_shape=jax.ShapeDtypeStruct((m_pad, N), x.dtype),
        grid=grid,
        in_specs=in_specs,
        out_specs=out_specs,
        compiler_params=pltpu.CompilerParams(
            dimension_semantics=dims, vmem_limit_bytes=_VMEM_LIMIT_BYTES),
        cost_estimate=cost,
    )(xp, gamma.reshape(1, K), beta.reshape(1, K), w, b.reshape(1, N))
    return out[:M] if m_pad != M else out


# ----------------------------------------------------------------------------
# Kernel: matmul (+ bias, optional GELU / residual), bf16 operands, f32 acc
# ----------------------------------------------------------------------------

def _matmul_direct_kernel(x_ref, w_ref, b_ref, *rest, gelu, has_residual):
    """Single-K-tile matmul: write result directly (no scratch accumulator)."""
    if has_residual:
        res_ref, o_ref = rest
    else:
        (o_ref,) = rest
    y = jnp.dot(x_ref[...].astype(jnp.bfloat16), w_ref[...],
                preferred_element_type=jnp.float32) + b_ref[...]
    if gelu:
        y = _gelu(y)
    if has_residual:
        y = y + res_ref[...].astype(jnp.float32)
    o_ref[...] = y.astype(o_ref.dtype)


def _matmul_acc_kernel(x_ref, w_ref, b_ref, *rest, gelu, has_residual):
    """K-tiled matmul with f32 VMEM accumulator (reduction axis innermost)."""
    if has_residual:
        res_ref, o_ref, acc_ref = rest
    else:
        o_ref, acc_ref = rest

    @pl.when(pl.program_id(2) == 0)
    def _():
        acc_ref[...] = jnp.zeros_like(acc_ref)

    acc_ref[...] += jnp.dot(x_ref[...].astype(jnp.bfloat16), w_ref[...],
                            preferred_element_type=jnp.float32)

    @pl.when(pl.program_id(2) == pl.num_programs(2) - 1)
    def _():
        y = acc_ref[...] + b_ref[...]
        if gelu:
            y = _gelu(y)
        if has_residual:
            y = y + res_ref[...].astype(jnp.float32)
        o_ref[...] = y.astype(o_ref.dtype)


def matmul(x, w, b, residual=None, gelu=False):
    """y = [gelu](x @ w + b) [+ residual]. x:(M,K) f32, w:(K,N) bf16 -> (M,N) f32."""
    M, K = x.shape
    N = w.shape[1]
    has_res = residual is not None

    tm = min(_TM_TARGET, _round_up(M, 8))
    m_pad = _round_up(M, tm)
    xp = _pad_rows(x, m_pad)
    resp = _pad_rows(residual, m_pad) if has_res else None
    b2 = b.reshape(1, N)
    w_bytes = K * N * w.dtype.itemsize

    cost = pl.CostEstimate(
        flops=2 * m_pad * N * K,
        transcendentals=(m_pad * N) if gelu else 0,
        bytes_accessed=4 * (m_pad * K + m_pad * N * (2 if has_res else 1)) + 2 * K * N,
    )

    scratch = []
    if _resident_fits(tm, K, N, w_bytes, has_res):
        grid = (m_pad // tm,)
        kern = functools.partial(_matmul_direct_kernel, gelu=gelu,
                                 has_residual=has_res)
        in_specs = [
            pl.BlockSpec((tm, K), lambda i: (i, 0)),
            pl.BlockSpec((K, N), lambda i: (0, 0)),     # weight resident
            pl.BlockSpec((1, N), lambda i: (0, 0)),
        ]
        args = [xp, w, b2]
        if has_res:
            in_specs.append(pl.BlockSpec((tm, N), lambda i: (i, 0)))
            args.append(resp)
        out_specs = pl.BlockSpec((tm, N), lambda i: (i, 0))
        dims = ("parallel",)
    else:
        tn = _pick_tile(N, _TN_TARGET, 128)
        tk = _pick_tile(K, _TK_TARGET, 128)
        kt = K // tk
        if kt == 1:
            # Single K tile: no accumulator; weight column block varies slowest.
            grid = (N // tn, m_pad // tm)
            kern = functools.partial(_matmul_direct_kernel, gelu=gelu,
                                     has_residual=has_res)
            in_specs = [
                pl.BlockSpec((tm, K), lambda j, i: (i, 0)),
                pl.BlockSpec((K, tn), lambda j, i: (0, j)),
                pl.BlockSpec((1, tn), lambda j, i: (0, j)),
            ]
            args = [xp, w, b2]
            if has_res:
                in_specs.append(pl.BlockSpec((tm, tn), lambda j, i: (i, j)))
                args.append(resp)
            out_specs = pl.BlockSpec((tm, tn), lambda j, i: (i, j))
            dims = ("parallel", "parallel")
        else:
            grid = (m_pad // tm, N // tn, kt)
            kern = functools.partial(_matmul_acc_kernel, gelu=gelu,
                                     has_residual=has_res)
            in_specs = [
                pl.BlockSpec((tm, tk), lambda i, j, k: (i, k)),
                pl.BlockSpec((tk, tn), lambda i, j, k: (k, j)),
                pl.BlockSpec((1, tn), lambda i, j, k: (0, j)),
            ]
            args = [xp, w, b2]
            if has_res:
                in_specs.append(pl.BlockSpec((tm, tn), lambda i, j, k: (i, j)))
                args.append(resp)
            out_specs = pl.BlockSpec((tm, tn), lambda i, j, k: (i, j))
            dims = ("parallel", "parallel", "arbitrary")
            scratch = [pltpu.VMEM((tm, tn), jnp.float32)]

    out = pl.pallas_call(
        kern,
        out_shape=jax.ShapeDtypeStruct((m_pad, N), x.dtype),
        grid=grid,
        in_specs=in_specs,
        out_specs=out_specs,
        scratch_shapes=scratch,
        compiler_params=pltpu.CompilerParams(
            dimension_semantics=dims, vmem_limit_bytes=_VMEM_LIMIT_BYTES),
        cost_estimate=cost,
    )(*args)
    return out[:M] if m_pad != M else out


# ----------------------------------------------------------------------------
# Kernel: multi-head attention (per batch element; heads sliced on the ref,
# stored per head -> bounded live ranges, no concat, lane-dense HBM writeback)
# ----------------------------------------------------------------------------
# TODO(synk): optional (B, n_heads) grid + head-major QKV layout for v7x's two
#             TensorCores, and flash-style Sq/Sk tiling for long sequences.

def _self_attn_kernel(qkv_ref, o_ref, *, n_heads, d_model, scale):
    dh = d_model // n_heads
    for h in range(n_heads):
        q = qkv_ref[0, :, pl.ds(h * dh, dh)].astype(jnp.float32) * scale
        k = qkv_ref[0, :, pl.ds(d_model + h * dh, dh)]
        v = qkv_ref[0, :, pl.ds(2 * d_model + h * dh, dh)]
        # contract last dims directly -- no explicit K transpose; bf16 MXU feed
        s = jax.lax.dot_general(q.astype(jnp.bfloat16), k.astype(jnp.bfloat16),
                                (((1,), (1,)), ((), ())),
                                preferred_element_type=jnp.float32)
        s = s - jnp.max(s, axis=-1, keepdims=True)
        p = jnp.exp(s)
        denom = jnp.sum(p, axis=-1, keepdims=True)
        o = jnp.dot(p.astype(jnp.bfloat16), v.astype(jnp.bfloat16),
                    preferred_element_type=jnp.float32)
        o_ref[0, :, pl.ds(h * dh, dh)] = (o / denom).astype(o_ref.dtype)


def _cross_attn_kernel(q_ref, kv_ref, o_ref, *, n_heads, d_model, scale):
    dh = d_model // n_heads
    for h in range(n_heads):
        q = q_ref[0, :, pl.ds(h * dh, dh)].astype(jnp.float32) * scale
        k = kv_ref[0, :, pl.ds(h * dh, dh)]
        v = kv_ref[0, :, pl.ds(d_model + h * dh, dh)]
        s = jax.lax.dot_general(q.astype(jnp.bfloat16), k.astype(jnp.bfloat16),
                                (((1,), (1,)), ((), ())),
                                preferred_element_type=jnp.float32)
        s = s - jnp.max(s, axis=-1, keepdims=True)
        p = jnp.exp(s)
        denom = jnp.sum(p, axis=-1, keepdims=True)
        o = jnp.dot(p.astype(jnp.bfloat16), v.astype(jnp.bfloat16),
                    preferred_element_type=jnp.float32)
        o_ref[0, :, pl.ds(h * dh, dh)] = (o / denom).astype(o_ref.dtype)


def attention_self(qkv, n_heads, d_model):
    """qkv: (B, S, 3D) -> (B, S, D)."""
    B, S, D3 = qkv.shape
    scale = 1.0 / math.sqrt(d_model // n_heads)
    kern = functools.partial(_self_attn_kernel, n_heads=n_heads,
                             d_model=d_model, scale=scale)
    return pl.pallas_call(
        kern,
        out_shape=jax.ShapeDtypeStruct((B, S, d_model), qkv.dtype),
        grid=(B,),
        in_specs=[pl.BlockSpec((1, S, D3), lambda b: (b, 0, 0))],
        out_specs=pl.BlockSpec((1, S, d_model), lambda b: (b, 0, 0)),
        compiler_params=pltpu.CompilerParams(
            dimension_semantics=("parallel",),
            vmem_limit_bytes=_VMEM_LIMIT_BYTES),
    )(qkv)


def attention_cross(q, kv, n_heads, d_model):
    """q: (B, St, D), kv: (B, Ss, 2D) -> (B, St, D)."""
    B, St, D = q.shape
    Ss, D2 = kv.shape[1], kv.shape[2]
    scale = 1.0 / math.sqrt(d_model // n_heads)
    kern = functools.partial(_cross_attn_kernel, n_heads=n_heads,
                             d_model=d_model, scale=scale)
    return pl.pallas_call(
        kern,
        out_shape=jax.ShapeDtypeStruct((B, St, d_model), q.dtype),
        grid=(B,),
        in_specs=[
            pl.BlockSpec((1, St, D), lambda b: (b, 0, 0)),
            pl.BlockSpec((1, Ss, D2), lambda b: (b, 0, 0)),
        ],
        out_specs=pl.BlockSpec((1, St, d_model), lambda b: (b, 0, 0)),
        compiler_params=pltpu.CompilerParams(
            dimension_semantics=("parallel",),
            vmem_limit_bytes=_VMEM_LIMIT_BYTES),
    )(q, kv)


# ----------------------------------------------------------------------------
# Transformer blocks (pre-norm; LN / residual work fused into the kernels)
# ----------------------------------------------------------------------------

def self_attention_block(p, x, n_heads):
    B, S, D = x.shape
    x2 = x.reshape(B * S, D)
    qkv = ln_matmul(x2, p["ln_g"], p["ln_b"], p["w_qkv"], p["b_qkv"])
    qkv = qkv.reshape(B, S, 3 * D)
    attn = attention_self(qkv, n_heads, D)                      # (B, S, D)
    out = matmul(attn.reshape(B * S, D), p["wo"], p["bo"], residual=x2)
    return out.reshape(B, S, D)


def cross_attention_block(p, y, kv, n_heads):
    """kv: (B, Ss, 2D) precomputed (batched over all decoder layers)."""
    B, St, D = y.shape
    y2 = y.reshape(B * St, D)
    q = ln_matmul(y2, p["ln_g"], p["ln_b"], p["wq"], p["bq"]).reshape(B, St, D)
    attn = attention_cross(q, kv, n_heads, D)                   # (B, St, D)
    out = matmul(attn.reshape(B * St, D), p["wo"], p["bo"], residual=y2)
    return out.reshape(B, St, D)


def ffn_block(p, x):
    B, S, D = x.shape
    x2 = x.reshape(B * S, D)
    h = ln_matmul(x2, p["ln_g"], p["ln_b"], p["w1"], p["b1"], gelu=True)
    out = matmul(h, p["w2"], p["b2"], residual=x2)
    return out.reshape(B, S, D)


def sinusoidal_pe(max_len, d_model):
    pos = jnp.arange(max_len, dtype=jnp.float32)[:, None]
    div = jnp.exp(jnp.arange(0, d_model, 2, dtype=jnp.float32)
                  * (-math.log(10000.0) / d_model))
    pe = jnp.zeros((max_len, d_model), jnp.float32)
    pe = pe.at[:, 0::2].set(jnp.sin(pos * div))
    pe = pe.at[:, 1::2].set(jnp.cos(pos * div))
    return pe


def chemformer_forward(params, src, tgt, *, n_heads, vocab_size):
    """src, tgt: (batch, seq) int32 -> logits (batch, tgt_seq, vocab)."""
    emb = params["emb"]                     # (vocab, d_model)
    pe = params["pe"]                       # (max_seq_len, d_model)

    # encode
    x = jnp.take(emb, src, axis=0)          # (B, Ss, D) -- gather kept in JAX
    x = x + pe[None, : x.shape[1], :]
    for lp in params["enc_layers"]:
        x = self_attention_block(lp["attn"], x, n_heads)
        x = ffn_block(lp["ffn"], x)
    memory = x

    # batched cross-attention K/V projection (memory read from HBM once)
    B, Ss, D = memory.shape
    kv_all = matmul(memory.reshape(B * Ss, D),
                    params["dec_w_kv_all"], params["dec_b_kv_all"])
    # kv_all: (B*Ss, n_dec_layers * 2D)

    # decode
    y = jnp.take(emb, tgt, axis=0)          # (B, St, D)
    y = y + pe[None, : y.shape[1], :]
    for li, lp in enumerate(params["dec_layers"]):
        kv_l = kv_all[:, li * 2 * D:(li + 1) * 2 * D].reshape(B, Ss, 2 * D)
        y = self_attention_block(lp["self"], y, n_heads)
        y = cross_attention_block(lp["cross"], y, kv_l, n_heads)
        y = ffn_block(lp["ffn"], y)

    # token_fc: vocab dim pre-padded to a multiple of 128 (lane-dense stores);
    # pad sliced off with a STATIC index (vocab_size is a Python int).
    Bt, St, _ = y.shape
    logits = matmul(y.reshape(Bt * St, D),
                    params["token_fc_w"], params["token_fc_b"])
    return logits[:, :vocab_size].reshape(Bt, St, vocab_size)


# ----------------------------------------------------------------------------
# Deterministic parameter initialization (matmul weights stored in bf16)
# ----------------------------------------------------------------------------

def _bf16(x):
    return x.astype(jnp.bfloat16)


def _init_self_attn(key, d_model):
    k1, k2 = jax.random.split(key)
    s = 0.02
    return {
        "ln_g": jnp.ones((d_model,), jnp.float32),
        "ln_b": jnp.zeros((d_model,), jnp.float32),
        "w_qkv": _bf16(jax.random.normal(k1, (d_model, 3 * d_model), jnp.float32) * s),
        "b_qkv": jnp.zeros((3 * d_model,), jnp.float32),
        "wo": _bf16(jax.random.normal(k2, (d_model, d_model), jnp.float32) * s),
        "bo": jnp.zeros((d_model,), jnp.float32),
    }


def _init_cross_attn(key, d_model):
    k1, k2, k3 = jax.random.split(key, 3)
    s = 0.02
    return {
        "ln_g": jnp.ones((d_model,), jnp.float32),
        "ln_b": jnp.zeros((d_model,), jnp.float32),
        "wq": _bf16(jax.random.normal(k1, (d_model, d_model), jnp.float32) * s),
        "bq": jnp.zeros((d_model,), jnp.float32),
        "w_kv": _bf16(jax.random.normal(k2, (d_model, 2 * d_model), jnp.float32) * s),
        "b_kv": jnp.zeros((2 * d_model,), jnp.float32),
        "wo": _bf16(jax.random.normal(k3, (d_model, d_model), jnp.float32) * s),
        "bo": jnp.zeros((d_model,), jnp.float32),
    }


def _init_ffn(key, d_model, d_ff):
    k1, k2 = jax.random.split(key)
    s = 0.02
    return {
        "ln_g": jnp.ones((d_model,), jnp.float32),
        "ln_b": jnp.zeros((d_model,), jnp.float32),
        "w1": _bf16(jax.random.normal(k1, (d_model, d_ff), jnp.float32) * s),
        "b1": jnp.zeros((d_ff,), jnp.float32),
        "w2": _bf16(jax.random.normal(k2, (d_ff, d_model), jnp.float32) * s),
        "b2": jnp.zeros((d_model,), jnp.float32),
    }


def init_params(key, vocab_size, d_model, n_layers, d_ff, max_seq_len):
    keys = jax.random.split(key, 2 + 2 * n_layers)
    vocab_pad = _round_up(vocab_size, 128)
    fc_w = jax.random.normal(keys[1], (d_model, vocab_size), jnp.float32) * 0.02
    params = {
        "emb": jax.random.normal(keys[0], (vocab_size, d_model), jnp.float32) * 0.02,
        "pe": sinusoidal_pe(max_seq_len, d_model),
        "token_fc_w": _bf16(jnp.pad(fc_w, ((0, 0), (0, vocab_pad - vocab_size)))),
        "token_fc_b": jnp.zeros((vocab_pad,), jnp.float32),
        "enc_layers": [],
        "dec_layers": [],
    }
    for li in range(n_layers):
        ka, kf = jax.random.split(keys[2 + li])
        params["enc_layers"].append({
            "attn": _init_self_attn(ka, d_model),
            "ffn": _init_ffn(kf, d_model, d_ff),
        })
    for li in range(n_layers):
        ka, kc, kf = jax.random.split(keys[2 + n_layers + li], 3)
        params["dec_layers"].append({
            "self": _init_self_attn(ka, d_model),
            "cross": _init_cross_attn(kc, d_model),
            "ffn": _init_ffn(kf, d_model, d_ff),
        })
    # Fuse all decoder cross-attention K/V projections into one weight so the
    # encoder memory is projected (and read from HBM) exactly once.
    params["dec_w_kv_all"] = jnp.concatenate(
        [lp["cross"].pop("w_kv") for lp in params["dec_layers"]], axis=1)
    params["dec_b_kv_all"] = jnp.concatenate(
        [lp["cross"].pop("b_kv") for lp in params["dec_layers"]], axis=0)
    return params


# ----------------------------------------------------------------------------
# Main
# ----------------------------------------------------------------------------

if __name__ == "__main__":
    vocab_size = 32
    d_model = 32
    n_heads = 4
    n_layers = 2
    d_ff = 64
    max_seq_len = 16
    batch = 2
    src_len = 8
    tgt_len = 8

    key = jax.random.PRNGKey(0)
    kp, ks, kt = jax.random.split(key, 3)
    params = init_params(kp, vocab_size, d_model, n_layers, d_ff, max_seq_len)

    src = jax.random.randint(ks, (batch, src_len), 0, vocab_size, dtype=jnp.int32)
    tgt = jax.random.randint(kt, (batch, tgt_len), 0, vocab_size, dtype=jnp.int32)

    fwd = jax.jit(functools.partial(chemformer_forward,
                                    n_heads=n_heads, vocab_size=vocab_size))
    logits = fwd(params, src, tgt)
    jax.block_until_ready(logits)

    assert logits.shape == (batch, tgt_len, vocab_size), logits.shape
    assert logits.dtype == jnp.float32
    assert bool(jnp.all(jnp.isfinite(logits)))
    print("KERNEL_OK")
</pallas_src>

<mosaic_0001>
module attributes {stable_mosaic.version = 11 : i64} {
  func.func @_ln_matmul_kernel(%arg0: i32, %arg1: memref<16x32xf32, #tpu.memory_space<vmem>>, %arg2: memref<1x32xf32, #tpu.memory_space<vmem>>, %arg3: memref<1x32xf32, #tpu.memory_space<vmem>>, %arg4: memref<32x96xbf16, #tpu.memory_space<vmem>>, %arg5: memref<1x96xf32, #tpu.memory_space<vmem>>, %arg6: memref<16x96xf32, #tpu.memory_space<vmem>>) attributes {dimension_semantics = [#tpu.dimension_semantics<parallel>], iteration_bounds = array<i64: 1>, scalar_prefetch = 0 : i64, scratch_operands = 0 : i64, tpu.core_type = #tpu.core_type<tc>, window_params = [{transform_indices = @transform_0, window_bounds = array<i64: 16, 32>}, {pipeline_mode = #tpu.pipeline_mode<synchronous>, transform_indices = @transform_1, window_bounds = array<i64: 1, 32>}, {pipeline_mode = #tpu.pipeline_mode<synchronous>, transform_indices = @transform_2, window_bounds = array<i64: 1, 32>}, {pipeline_mode = #tpu.pipeline_mode<synchronous>, transform_indices = @transform_3, window_bounds = array<i64: 32, 96>}, {pipeline_mode = #tpu.pipeline_mode<synchronous>, transform_indices = @transform_4, window_bounds = array<i64: 1, 96>}, {transform_indices = @transform_5, window_bounds = array<i64: 16, 96>}]} {
    %c0 = arith.constant 0 : index
    %c0_0 = arith.constant 0 : index
    %0 = vector.load %arg1[%c0, %c0_0] : memref<16x32xf32, #tpu.memory_space<vmem>>, vector<16x32xf32>
    %cst = arith.constant dense<0.000000e+00> : vector<16xf32>
    %1 = vector.multi_reduction <add>, %0, %cst [1] : vector<16x32xf32> to vector<16xf32>
    %2 = vector.shape_cast %1 : vector<16xf32> to vector<16x1xf32>
    %cst_1 = arith.constant 3.200000e+01 : f32
    %3 = vector.broadcast %cst_1 : f32 to vector<16x1xf32>
    %4 = arith.divf %2, %3 : vector<16x1xf32>
    %5 = vector.broadcast %4 : vector<16x1xf32> to vector<16x32xf32>
    %6 = arith.subf %0, %5 : vector<16x32xf32>
    %7 = arith.mulf %6, %6 : vector<16x32xf32>
    %cst_2 = arith.constant dense<0.000000e+00> : vector<16xf32>
    %8 = vector.multi_reduction <add>, %7, %cst_2 [1] : vector<16x32xf32> to vector<16xf32>
    %9 = vector.shape_cast %8 : vector<16xf32> to vector<16x1xf32>
    %cst_3 = arith.constant 3.200000e+01 : f32
    %10 = vector.broadcast %cst_3 : f32 to vector<16x1xf32>
    %11 = arith.divf %9, %10 : vector<16x1xf32>
    %12 = vector.broadcast %4 : vector<16x1xf32> to vector<16x32xf32>
    %13 = arith.subf %0, %12 : vector<16x32xf32>
    %cst_4 = arith.constant 9.99999974E-6 : f32
    %14 = vector.broadcast %cst_4 : f32 to vector<16x1xf32>
    %15 = arith.addf %11, %14 : vector<16x1xf32>
    %16 = math.rsqrt %15 : vector<16x1xf32>
    %17 = vector.broadcast %16 : vector<16x1xf32> to vector<16x32xf32>
    %18 = arith.mulf %13, %17 : vector<16x32xf32>
    %c0_5 = arith.constant 0 : index
    %c0_6 = arith.constant 0 : index
    %19 = vector.load %arg2[%c0_5, %c0_6] : memref<1x32xf32, #tpu.memory_space<vmem>>, vector<1x32xf32>
    %20 = vector.broadcast %19 : vector<1x32xf32> to vector<16x32xf32>
    %21 = arith.mulf %18, %20 : vector<16x32xf32>
    %c0_7 = arith.constant 0 : index
    %c0_8 = arith.constant 0 : index
    %22 = vector.load %arg3[%c0_7, %c0_8] : memref<1x32xf32, #tpu.memory_space<vmem>>, vector<1x32xf32>
    %23 = vector.broadcast %22 : vector<1x32xf32> to vector<16x32xf32>
    %24 = arith.addf %21, %23 : vector<16x32xf32>
    %25 = arith.truncf %24 : vector<16x32xf32> to vector<16x32xbf16>
    %c0_9 = arith.constant 0 : index
    %c0_10 = arith.constant 0 : index
    %26 = vector.load %arg4[%c0_9, %c0_10] : memref<32x96xbf16, #tpu.memory_space<vmem>>, vector<32x96xbf16>
    %cst_11 = arith.constant dense<0.000000e+00> : vector<16x96xf32>
    %27 = tpu.matmul %25, %26, %cst_11 {dimension_numbers = #tpu.dot_dimension_numbers<[1], [0], [0], [1], [0, 0, 1, 1], [], []>} : vector<16x32xbf16>, vector<32x96xbf16>, vector<16x96xf32> -> vector<16x96xf32>
    %c0_12 = arith.constant 0 : index
    %c0_13 = arith.constant 0 : index
    %28 = vector.load %arg5[%c0_12, %c0_13] : memref<1x96xf32, #tpu.memory_space<vmem>>, vector<1x96xf32>
    %29 = vector.broadcast %28 : vector<1x96xf32> to vector<16x96xf32>
    %30 = arith.addf %27, %29 : vector<16x96xf32>
    %c0_14 = arith.constant 0 : index
    %c0_15 = arith.constant 0 : index
    %31 = vector.load %arg6[%c0_14, %c0_15] : memref<16x96xf32, #tpu.memory_space<vmem>>, vector<16x96xf32>
    tpu.vector_store %arg6[%c0_14, %c0_15], %30 {strides = array<i32>} : memref<16x96xf32, #tpu.memory_space<vmem>>, vector<16x96xf32>,
    return
  }
  func.func @transform_0(%arg0: i32) -> (i32, i32) {
    %c0_i32 = arith.constant 0 : i32
    %c0_i32_0 = arith.constant 0 : i32
    return %arg0, %c0_i32 : i32, i32
  }
  func.func @transform_1(%arg0: i32) -> (i32, i32) {
    %c0_i32 = arith.constant 0 : i32
    %c0_i32_0 = arith.constant 0 : i32
    %c0_i32_1 = arith.constant 0 : i32
    return %c0_i32, %c0_i32_0 : i32, i32
  }
  func.func @transform_2(%arg0: i32) -> (i32, i32) {
    %c0_i32 = arith.constant 0 : i32
    %c0_i32_0 = arith.constant 0 : i32
    %c0_i32_1 = arith.constant 0 : i32
    return %c0_i32, %c0_i32_0 : i32, i32
  }
  func.func @transform_3(%arg0: i32) -> (i32, i32) {
    %c0_i32 = arith.constant 0 : i32
    %c0_i32_0 = arith.constant 0 : i32
    %c0_i32_1 = arith.constant 0 : i32
    return %c0_i32, %c0_i32_0 : i32, i32
  }
  func.func @transform_4(%arg0: i32) -> (i32, i32) {
    %c0_i32 = arith.constant 0 : i32
    %c0_i32_0 = arith.constant 0 : i32
    %c0_i32_1 = arith.constant 0 : i32
    return %c0_i32, %c0_i32_0 : i32, i32
  }
  func.func @transform_5(%arg0: i32) -> (i32, i32) {
    %c0_i32 = arith.constant 0 : i32
    %c0_i32_0 = arith.constant 0 : i32
    return %arg0, %c0_i32 : i32, i32
  }
}

module attributes {stable_mosaic.version = 11 : i64} {
  func.func @_self_attn_kernel(%arg0: i32, %arg1: memref<1x8x96xf32, #tpu.memory_space<vmem>>, %arg2: memref<1x8x32xf32, #tpu.memory_space<vmem>>) attributes {dimension_semantics = [#tpu.dimension_semantics<parallel>], iteration_bounds = array<i64: 2>, scalar_prefetch = 0 : i64, scratch_operands = 0 : i64, tpu.core_type = #tpu.core_type<tc>, window_params = [{transform_indices = @transform_0, window_bounds = array<i64: 1, 8, 96>}, {transform_indices = @transform_1, window_bounds = array<i64: 1, 8, 32>}]} {
    %c0 = arith.constant 0 : index
    %c0_0 = arith.constant 0 : index
    %c0_1 = arith.constant 0 : index
    %0 = vector.load %arg1[%c0, %c0_0, %c0_1] : memref<1x8x96xf32, #tpu.memory_space<vmem>>, vector<1x8x8xf32>
    %1 = vector.shape_cast %0 : vector<1x8x8xf32> to vector<8x8xf32>
    %cst = arith.constant 0.353553385 : f32
    %2 = vector.broadcast %cst : f32 to vector<8x8xf32>
    %3 = arith.mulf %1, %2 : vector<8x8xf32>
    %c0_2 = arith.constant 0 : index
    %c0_3 = arith.constant 0 : index
    %c32 = arith.constant 32 : index
    %4 = vector.load %arg1[%c0_2, %c0_3, %c32] : memref<1x8x96xf32, #tpu.memory_space<vmem>>, vector<1x8x8xf32>
    %5 = vector.shape_cast %4 : vector<1x8x8xf32> to vector<8x8xf32>
    %c0_4 = arith.constant 0 : index
    %c0_5 = arith.constant 0 : index
    %c64 = arith.constant 64 : index
    %6 = vector.load %arg1[%c0_4, %c0_5, %c64] : memref<1x8x96xf32, #tpu.memory_space<vmem>>, vector<1x8x8xf32>
    %7 = vector.shape_cast %6 : vector<1x8x8xf32> to vector<8x8xf32>
    %8 = arith.truncf %3 : vector<8x8xf32> to vector<8x8xbf16>
    %9 = arith.truncf %5 : vector<8x8xf32> to vector<8x8xbf16>
    %cst_6 = arith.constant dense<0.000000e+00> : vector<8x8xf32>
    %10 = tpu.matmul %8, %9, %cst_6 {dimension_numbers = #tpu.dot_dimension_numbers<[1], [1], [0], [0], [0, 0, 1, 0], [], []>} : vector<8x8xbf16>, vector<8x8xbf16>, vector<8x8xf32> -> vector<8x8xf32>
    %cst_7 = arith.constant dense<0xFF800000> : vector<8xf32>
    %11 = vector.multi_reduction <maximumf>, %10, %cst_7 [1] : vector<8x8xf32> to vector<8xf32>
    %12 = vector.shape_cast %11 : vector<8xf32> to vector<8x1xf32>
    %13 = vector.broadcast %12 : vector<8x1xf32> to vector<8x8xf32>
    %14 = arith.subf %10, %13 : vector<8x8xf32>
    %15 = math.exp %14 : vector<8x8xf32>
    %cst_8 = arith.constant dense<0.000000e+00> : vector<8xf32>
    %16 = vector.multi_reduction <add>, %15, %cst_8 [1] : vector<8x8xf32> to vector<8xf32>
    %17 = vector.shape_cast %16 : vector<8xf32> to vector<8x1xf32>
    %18 = arith.truncf %15 : vector<8x8xf32> to vector<8x8xbf16>
    %19 = arith.truncf %7 : vector<8x8xf32> to vector<8x8xbf16>
    %cst_9 = arith.constant dense<0.000000e+00> : vector<8x8xf32>
    %20 = tpu.matmul %18, %19, %cst_9 {dimension_numbers = #tpu.dot_dimension_numbers<[1], [0], [0], [1], [0, 0, 1, 1], [], []>} : vector<8x8xbf16>, vector<8x8xbf16>, vector<8x8xf32> -> vector<8x8xf32>
    %21 = vector.broadcast %17 : vector<8x1xf32> to vector<8x8xf32>
    %22 = arith.divf %20, %21 : vector<8x8xf32>
    %c0_10 = arith.constant 0 : index
    %c0_11 = arith.constant 0 : index
    %c0_12 = arith.constant 0 : index
    %23 = vector.load %arg2[%c0_10, %c0_11, %c0_12] : memref<1x8x32xf32, #tpu.memory_space<vmem>>, vector<1x8x8xf32>
    %24 = vector.shape_cast %23 : vector<1x8x8xf32> to vector<8x8xf32>
    %25 = vector.shape_cast %22 : vector<8x8xf32> to vector<1x8x8xf32>
    tpu.vector_store %arg2[%c0_10, %c0_11, %c0_12], %25 {strides = array<i32>} : memref<1x8x32xf32, #tpu.memory_space<vmem>>, vector<1x8x8xf32>,
    %c0_13 = arith.constant 0 : index
    %c0_14 = arith.constant 0 : index
    %c8 = arith.constant 8 : index
    %26 = vector.load %arg1[%c0_13, %c0_14, %c8] : memref<1x8x96xf32, #tpu.memory_space<vmem>>, vector<1x8x8xf32>
    %27 = vector.shape_cast %26 : vector<1x8x8xf32> to vector<8x8xf32>
    %cst_15 = arith.constant 0.353553385 : f32
    %28 = vector.broadcast %cst_15 : f32 to vector<8x8xf32>
    %29 = arith.mulf %27, %28 : vector<8x8xf32>
    %c0_16 = arith.constant 0 : index
    %c0_17 = arith.constant 0 : index
    %c40 = arith.constant 40 : index
    %30 = vector.load %arg1[%c0_16, %c0_17, %c40] : memref<1x8x96xf32, #tpu.memory_space<vmem>>, vector<1x8x8xf32>
    %31 = vector.shape_cast %30 : vector<1x8x8xf32> to vector<8x8xf32>
    %c0_18 = arith.constant 0 : index
    %c0_19 = arith.constant 0 : index
    %c72 = arith.constant 72 : index
    %32 = vector.load %arg1[%c0_18, %c0_19, %c72] : memref<1x8x96xf32, #tpu.memory_space<vmem>>, vector<1x8x8xf32>
    %33 = vector.shape_cast %32 : vector<1x8x8xf32> to vector<8x8xf32>
    %34 = arith.truncf %29 : vector<8x8xf32> to vector<8x8xbf16>
    %35 = arith.truncf %31 : vector<8x8xf32> to vector<8x8xbf16>
    %cst_20 = arith.constant dense<0.000000e+00> : vector<8x8xf32>
    %36 = tpu.matmul %34, %35, %cst_20 {dimension_numbers = #tpu.dot_dimension_numbers<[1], [1], [0], [0], [0, 0, 1, 0], [], []>} : vector<8x8xbf16>, vector<8x8xbf16>, vector<8x8xf32> -> vector<8x8xf32>
    %cst_21 = arith.constant dense<0xFF800000> : vector<8xf32>
    %37 = vector.multi_reduction <maximumf>, %36, %cst_21 [1] : vector<8x8xf32> to vector<8xf32>
    %38 = vector.shape_cast %37 : vector<8xf32> to vector<8x1xf32>
    %39 = vector.broadcast %38 : vector<8x1xf32> to vector<8x8xf32>
    %40 = arith.subf %36, %39 : vector<8x8xf32>
    %41 = math.exp %40 : vector<8x8xf32>
    %cst_22 = arith.constant dense<0.000000e+00> : vector<8xf32>
    %42 = vector.multi_reduction <add>, %41, %cst_22 [1] : vector<8x8xf32> to vector<8xf32>
    %43 = vector.shape_cast %42 : vector<8xf32> to vector<8x1xf32>
    %44 = arith.truncf %41 : vector<8x8xf32> to vector<8x8xbf16>
    %45 = arith.truncf %33 : vector<8x8xf32> to vector<8x8xbf16>
    %cst_23 = arith.constant dense<0.000000e+00> : vector<8x8xf32>
    %46 = tpu.matmul %44, %45, %cst_23 {dimension_numbers = #tpu.dot_dimension_numbers<[1], [0], [0], [1], [0, 0, 1, 1], [], []>} : vector<8x8xbf16>, vector<8x8xbf16>, vector<8x8xf32> -> vector<8x8xf32>
    %47 = vector.broadcast %43 : vector<8x1xf32> to vector<8x8xf32>
    %48 = arith.divf %46, %47 : vector<8x8xf32>
    %c0_24 = arith.constant 0 : index
    %c0_25 = arith.constant 0 : index
    %c8_26 = arith.constant 8 : index
    %49 = vector.load %arg2[%c0_24, %c0_25, %c8_26] : memref<1x8x32xf32, #tpu.memory_space<vmem>>, vector<1x8x8xf32>
    %50 = vector.shape_cast %49 : vector<1x8x8xf32> to vector<8x8xf32>
    %51 = vector.shape_cast %48 : vector<8x8xf32> to vector<1x8x8xf32>
    tpu.vector_store %arg2[%c0_24, %c0_25, %c8_26], %51 {strides = array<i32>} : memref<1x8x32xf32, #tpu.memory_space<vmem>>, vector<1x8x8xf32>,
    %c0_27 = arith.constant 0 : index
    %c0_28 = arith.constant 0 : index
    %c16 = arith.constant 16 : index
    %52 = vector.load %arg1[%c0_27, %c0_28, %c16] : memref<1x8x96xf32, #tpu.memory_space<vmem>>, vector<1x8x8xf32>
    %53 = vector.shape_cast %52 : vector<1x8x8xf32> to vector<8x8xf32>
    %cst_29 = arith.constant 0.353553385 : f32
    %54 = vector.broadcast %cst_29 : f32 to vector<8x8xf32>
    %55 = arith.mulf %53, %54 : vector<8x8xf32>
    %c0_30 = arith.constant 0 : index
    %c0_31 = arith.constant 0 : index
    %c48 = arith.constant 48 : index
    %56 = vector.load %arg1[%c0_30, %c0_31, %c48] : memref<1x8x96xf32, #tpu.memory_space<vmem>>, vector<1x8x8xf32>
    %57 = vector.shape_cast %56 : vector<1x8x8xf32> to vector<8x8xf32>
    %c0_32 = arith.constant 0 : index
    %c0_33 = arith.constant 0 : index
    %c80 = arith.constant 80 : index
    %58 = vector.load %arg1[%c0_32, %c0_33, %c80] : memref<1x8x96xf32, #tpu.memory_space<vmem>>, vector<1x8x8xf32>
    %59 = vector.shape_cast %58 : vector<1x8x8xf32> to vector<8x8xf32>
    %60 = arith.truncf %55 : vector<8x8xf32> to vector<8x8xbf16>
    %61 = arith.truncf %57 : vector<8x8xf32> to vector<8x8xbf16>
    %cst_34 = arith.constant dense<0.000000e+00> : vector<8x8xf32>
    %62 = tpu.matmul %60, %61, %cst_34 {dimension_numbers = #tpu.dot_dimension_numbers<[1], [1], [0], [0], [0, 0, 1, 0], [], []>} : vector<8x8xbf16>, vector<8x8xbf16>, vector<8x8xf32> -> vector<8x8xf32>
    %cst_35 = arith.constant dense<0xFF800000> : vector<8xf32>
    %63 = vector.multi_reduction <maximumf>, %62, %cst_35 [1] : vector<8x8xf32> to vector<8xf32>
    %64 = vector.shape_cast %63 : vector<8xf32> to vector<8x1xf32>
    %65 = vector.broadcast %64 : vector<8x1xf32> to vector<8x8xf32>
    %66 = arith.subf %62, %65 : vector<8x8xf32>
    %67 = math.exp %66 : vector<8x8xf32>
    %cst_36 = arith.constant dense<0.000000e+00> : vector<8xf32>
    %68 = vector.multi_reduction <add>, %67, %cst_36 [1] : vector<8x8xf32> to vector<8xf32>
    %69 = vector.shape_cast %68 : vector<8xf32> to vector<8x1xf32>
    %70 = arith.truncf %67 : vector<8x8xf32> to vector<8x8xbf16>
    %71 = arith.truncf %59 : vector<8x8xf32> to vector<8x8xbf16>
    %cst_37 = arith.constant dense<0.000000e+00> : vector<8x8xf32>
    %72 = tpu.matmul %70, %71, %cst_37 {dimension_numbers = #tpu.dot_dimension_numbers<[1], [0], [0], [1], [0, 0, 1, 1], [], []>} : vector<8x8xbf16>, vector<8x8xbf16>, vector<8x8xf32> -> vector<8x8xf32>
    %73 = vector.broadcast %69 : vector<8x1xf32> to vector<8x8xf32>
    %74 = arith.divf %72, %73 : vector<8x8xf32>
    %c0_38 = arith.constant 0 : index
    %c0_39 = arith.constant 0 : index
    %c16_40 = arith.constant 16 : index
    %75 = vector.load %arg2[%c0_38, %c0_39, %c16_40] : memref<1x8x32xf32, #tpu.memory_space<vmem>>, vector<1x8x8xf32>
    %76 = vector.shape_cast %75 : vector<1x8x8xf32> to vector<8x8xf32>
    %77 = vector.shape_cast %74 : vector<8x8xf32> to vector<1x8x8xf32>
    tpu.vector_store %arg2[%c0_38, %c0_39, %c16_40], %77 {strides = array<i32>} : memref<1x8x32xf32, #tpu.memory_space<vmem>>, vector<1x8x8xf32>,
    %c0_41 = arith.constant 0 : index
    %c0_42 = arith.constant 0 : index
    %c24 = arith.constant 24 : index
    %78 = vector.load %arg1[%c0_41, %c0_42, %c24] : memref<1x8x96xf32, #tpu.memory_space<vmem>>, vector<1x8x8xf32>
    %79 = vector.shape_cast %78 : vector<1x8x8xf32> to vector<8x8xf32>
    %cst_43 = arith.constant 0.353553385 : f32
    %80 = vector.broadcast %cst_43 : f32 to vector<8x8xf32>
    %81 = arith.mulf %79, %80 : vector<8x8xf32>
    %c0_44 = arith.constant 0 : index
    %c0_45 = arith.constant 0 : index
    %c56 = arith.constant 56 : index
    %82 = vector.load %arg1[%c0_44, %c0_45, %c56] : memref<1x8x96xf32, #tpu.memory_space<vmem>>, vector<1x8x8xf32>
    %83 = vector.shape_cast %82 : vector<1x8x8xf32> to vector<8x8xf32>
    %c0_46 = arith.constant 0 : index
    %c0_47 = arith.constant 0 : index
    %c88 = arith.constant 88 : index
    %84 = vector.load %arg1[%c0_46, %c0_47, %c88] : memref<1x8x96xf32, #tpu.memory_space<vmem>>, vector<1x8x8xf32>
    %85 = vector.shape_cast %84 : vector<1x8x8xf32> to vector<8x8xf32>
    %86 = arith.truncf %81 : vector<8x8xf32> to vector<8x8xbf16>
    %87 = arith.truncf %83 : vector<8x8xf32> to vector<8x8xbf16>
    %cst_48 = arith.constant dense<0.000000e+00> : vector<8x8xf32>
    %88 = tpu.matmul %86, %87, %cst_48 {dimension_numbers = #tpu.dot_dimension_numbers<[1], [1], [0], [0], [0, 0, 1, 0], [], []>} : vector<8x8xbf16>, vector<8x8xbf16>, vector<8x8xf32> -> vector<8x8xf32>
    %cst_49 = arith.constant dense<0xFF800000> : vector<8xf32>
    %89 = vector.multi_reduction <maximumf>, %88, %cst_49 [1] : vector<8x8xf32> to vector<8xf32>
    %90 = vector.shape_cast %89 : vector<8xf32> to vector<8x1xf32>
    %91 = vector.broadcast %90 : vector<8x1xf32> to vector<8x8xf32>
    %92 = arith.subf %88, %91 : vector<8x8xf32>
    %93 = math.exp %92 : vector<8x8xf32>
    %cst_50 = arith.constant dense<0.000000e+00> : vector<8xf32>
    %94 = vector.multi_reduction <add>, %93, %cst_50 [1] : vector<8x8xf32> to vector<8xf32>
    %95 = vector.shape_cast %94 : vector<8xf32> to vector<8x1xf32>
    %96 = arith.truncf %93 : vector<8x8xf32> to vector<8x8xbf16>
    %97 = arith.truncf %85 : vector<8x8xf32> to vector<8x8xbf16>
    %cst_51 = arith.constant dense<0.000000e+00> : vector<8x8xf32>
    %98 = tpu.matmul %96, %97, %cst_51 {dimension_numbers = #tpu.dot_dimension_numbers<[1], [0], [0], [1], [0, 0, 1, 1], [], []>} : vector<8x8xbf16>, vector<8x8xbf16>, vector<8x8xf32> -> vector<8x8xf32>
    %99 = vector.broadcast %95 : vector<8x1xf32> to vector<8x8xf32>
    %100 = arith.divf %98, %99 : vector<8x8xf32>
    %c0_52 = arith.constant 0 : index
    %c0_53 = arith.constant 0 : index
    %c24_54 = arith.constant 24 : index
    %101 = vector.load %arg2[%c0_52, %c0_53, %c24_54] : memref<1x8x32xf32, #tpu.memory_space<vmem>>, vector<1x8x8xf32>
    %102 = vector.shape_cast %101 : vector<1x8x8xf32> to vector<8x8xf32>
    %103 = vector.shape_cast %100 : vector<8x8xf32> to vector<1x8x8xf32>
    tpu.vector_store %arg2[%c0_52, %c0_53, %c24_54], %103 {strides = array<i32>} : memref<1x8x32xf32, #tpu.memory_space<vmem>>, vector<1x8x8xf32>,
    return
  }
  func.func @transform_0(%arg0: i32) -> (i32, i32, i32) {
    %c0_i32 = arith.constant 0 : i32
    %c0_i32_0 = arith.constant 0 : i32
    %c0_i32_1 = arith.constant 0 : i32
    return %arg0, %c0_i32, %c0_i32_0 : i32, i32, i32
  }
  func.func @transform_1(%arg0: i32) -> (i32, i32, i32) {
    %c0_i32 = arith.constant 0 : i32
    %c0_i32_0 = arith.constant 0 : i32
    %c0_i32_1 = arith.constant 0 : i32
    return %arg0, %c0_i32, %c0_i32_0 : i32, i32, i32
  }
}

module attributes {stable_mosaic.version = 11 : i64} {
  func.func @_matmul_direct_kernel(%arg0: i32, %arg1: memref<16x32xf32, #tpu.memory_space<vmem>>, %arg2: memref<32x32xbf16, #tpu.memory_space<vmem>>, %arg3: memref<1x32xf32, #tpu.memory_space<vmem>>, %arg4: memref<16x32xf32, #tpu.memory_space<vmem>>, %arg5: memref<16x32xf32, #tpu.memory_space<vmem>>) attributes {dimension_semantics = [#tpu.dimension_semantics<parallel>], iteration_bounds = array<i64: 1>, scalar_prefetch = 0 : i64, scratch_operands = 0 : i64, tpu.core_type = #tpu.core_type<tc>, window_params = [{transform_indices = @transform_0, window_bounds = array<i64: 16, 32>}, {pipeline_mode = #tpu.pipeline_mode<synchronous>, transform_indices = @transform_1, window_bounds = array<i64: 32, 32>}, {pipeline_mode = #tpu.pipeline_mode<synchronous>, transform_indices = @transform_2, window_bounds = array<i64: 1, 32>}, {transform_indices = @transform_3, window_bounds = array<i64: 16, 32>}, {transform_indices = @transform_4, window_bounds = array<i64: 16, 32>}]} {
    %c0 = arith.constant 0 : index
    %c0_0 = arith.constant 0 : index
    %0 = vector.load %arg1[%c0, %c0_0] : memref<16x32xf32, #tpu.memory_space<vmem>>, vector<16x32xf32>
    %1 = arith.truncf %0 : vector<16x32xf32> to vector<16x32xbf16>
    %c0_1 = arith.constant 0 : index
    %c0_2 = arith.constant 0 : index
    %2 = vector.load %arg2[%c0_1, %c0_2] : memref<32x32xbf16, #tpu.memory_space<vmem>>, vector<32x32xbf16>
    %cst = arith.constant dense<0.000000e+00> : vector<16x32xf32>
    %3 = tpu.matmul %1, %2, %cst {dimension_numbers = #tpu.dot_dimension_numbers<[1], [0], [0], [1], [0, 0, 1, 1], [], []>} : vector<16x32xbf16>, vector<32x32xbf16>, vector<16x32xf32> -> vector<16x32xf32>
    %c0_3 = arith.constant 0 : index
    %c0_4 = arith.constant 0 : index
    %4 = vector.load %arg3[%c0_3, %c0_4] : memref<1x32xf32, #tpu.memory_space<vmem>>, vector<1x32xf32>
    %5 = vector.broadcast %4 : vector<1x32xf32> to vector<16x32xf32>
    %6 = arith.addf %3, %5 : vector<16x32xf32>
    %c0_5 = arith.constant 0 : index
    %c0_6 = arith.constant 0 : index
    %7 = vector.load %arg4[%c0_5, %c0_6] : memref<16x32xf32, #tpu.memory_space<vmem>>, vector<16x32xf32>
    %8 = arith.addf %6, %7 : vector<16x32xf32>
    %c0_7 = arith.constant 0 : index
    %c0_8 = arith.constant 0 : index
    %9 = vector.load %arg5[%c0_7, %c0_8] : memref<16x32xf32, #tpu.memory_space<vmem>>, vector<16x32xf32>
    tpu.vector_store %arg5[%c0_7, %c0_8], %8 {strides = array<i32>} : memref<16x32xf32, #tpu.memory_space<vmem>>, vector<16x32xf32>,
    return
  }
  func.func @transform_0(%arg0: i32) -> (i32, i32) {
    %c0_i32 = arith.constant 0 : i32
    %c0_i32_0 = arith.constant 0 : i32
    return %arg0, %c0_i32 : i32, i32
  }
  func.func @transform_1(%arg0: i32) -> (i32, i32) {
    %c0_i32 = arith.constant 0 : i32
    %c0_i32_0 = arith.constant 0 : i32
    %c0_i32_1 = arith.constant 0 : i32
    return %c0_i32, %c0_i32_0 : i32, i32
  }
  func.func @transform_2(%arg0: i32) -> (i32, i32) {
    %c0_i32 = arith.constant 0 : i32
    %c0_i32_0 = arith.constant 0 : i32
    %c0_i32_1 = arith.constant 0 : i32
    return %c0_i32, %c0_i32_0 : i32, i32
  }
  func.func @transform_3(%arg0: i32) -> (i32, i32) {
    %c0_i32 = arith.constant 0 : i32
    %c0_i32_0 = arith.constant 0 : i32
    return %arg0, %c0_i32 : i32, i32
  }
  func.func @transform_4(%arg0: i32) -> (i32, i32) {
    %c0_i32 = arith.constant 0 : i32
    %c0_i32_0 = arith.constant 0 : i32
    return %arg0, %c0_i32 : i32, i32
  }
}

module attributes {stable_mosaic.version = 11 : i64} {
  func.func @_ln_matmul_kernel(%arg0: i32, %arg1: memref<16x32xf32, #tpu.memory_space<vmem>>, %arg2: memref<1x32xf32, #tpu.memory_space<vmem>>, %arg3: memref<1x32xf32, #tpu.memory_space<vmem>>, %arg4: memref<32x64xbf16, #tpu.memory_space<vmem>>, %arg5: memref<1x64xf32, #tpu.memory_space<vmem>>, %arg6: memref<16x64xf32, #tpu.memory_space<vmem>>) attributes {dimension_semantics = [#tpu.dimension_semantics<parallel>], iteration_bounds = array<i64: 1>, scalar_prefetch = 0 : i64, scratch_operands = 0 : i64, tpu.core_type = #tpu.core_type<tc>, window_params = [{transform_indices = @transform_0, window_bounds = array<i64: 16, 32>}, {pipeline_mode = #tpu.pipeline_mode<synchronous>, transform_indices = @transform_1, window_bounds = array<i64: 1, 32>}, {pipeline_mode = #tpu.pipeline_mode<synchronous>, transform_indices = @transform_2, window_bounds = array<i64: 1, 32>}, {pipeline_mode = #tpu.pipeline_mode<synchronous>, transform_indices = @transform_3, window_bounds = array<i64: 32, 64>}, {pipeline_mode = #tpu.pipeline_mode<synchronous>, transform_indices = @transform_4, window_bounds = array<i64: 1, 64>}, {transform_indices = @transform_5, window_bounds = array<i64: 16, 64>}]} {
    %c0 = arith.constant 0 : index
    %c0_0 = arith.constant 0 : index
    %0 = vector.load %arg1[%c0, %c0_0] : memref<16x32xf32, #tpu.memory_space<vmem>>, vector<16x32xf32>
    %cst = arith.constant dense<0.000000e+00> : vector<16xf32>
    %1 = vector.multi_reduction <add>, %0, %cst [1] : vector<16x32xf32> to vector<16xf32>
    %2 = vector.shape_cast %1 : vector<16xf32> to vector<16x1xf32>
    %cst_1 = arith.constant 3.200000e+01 : f32
    %3 = vector.broadcast %cst_1 : f32 to vector<16x1xf32>
    %4 = arith.divf %2, %3 : vector<16x1xf32>
    %5 = vector.broadcast %4 : vector<16x1xf32> to vector<16x32xf32>
    %6 = arith.subf %0, %5 : vector<16x32xf32>
    %7 = arith.mulf %6, %6 : vector<16x32xf32>
    %cst_2 = arith.constant dense<0.000000e+00> : vector<16xf32>
    %8 = vector.multi_reduction <add>, %7, %cst_2 [1] : vector<16x32xf32> to vector<16xf32>
    %9 = vector.shape_cast %8 : vector<16xf32> to vector<16x1xf32>
    %cst_3 = arith.constant 3.200000e+01 : f32
    %10 = vector.broadcast %cst_3 : f32 to vector<16x1xf32>
    %11 = arith.divf %9, %10 : vector<16x1xf32>
    %12 = vector.broadcast %4 : vector<16x1xf32> to vector<16x32xf32>
    %13 = arith.subf %0, %12 : vector<16x32xf32>
    %cst_4 = arith.constant 9.99999974E-6 : f32
    %14 = vector.broadcast %cst_4 : f32 to vector<16x1xf32>
    %15 = arith.addf %11, %14 : vector<16x1xf32>
    %16 = math.rsqrt %15 : vector<16x1xf32>
    %17 = vector.broadcast %16 : vector<16x1xf32> to vector<16x32xf32>
    %18 = arith.mulf %13, %17 : vector<16x32xf32>
    %c0_5 = arith.constant 0 : index
    %c0_6 = arith.constant 0 : index
    %19 = vector.load %arg2[%c0_5, %c0_6] : memref<1x32xf32, #tpu.memory_space<vmem>>, vector<1x32xf32>
    %20 = vector.broadcast %19 : vector<1x32xf32> to vector<16x32xf32>
    %21 = arith.mulf %18, %20 : vector<16x32xf32>
    %c0_7 = arith.constant 0 : index
    %c0_8 = arith.constant 0 : index
    %22 = vector.load %arg3[%c0_7, %c0_8] : memref<1x32xf32, #tpu.memory_space<vmem>>, vector<1x32xf32>
    %23 = vector.broadcast %22 : vector<1x32xf32> to vector<16x32xf32>
    %24 = arith.addf %21, %23 : vector<16x32xf32>
    %25 = arith.truncf %24 : vector<16x32xf32> to vector<16x32xbf16>
    %c0_9 = arith.constant 0 : index
    %c0_10 = arith.constant 0 : index
    %26 = vector.load %arg4[%c0_9, %c0_10] : memref<32x64xbf16, #tpu.memory_space<vmem>>, vector<32x64xbf16>
    %cst_11 = arith.constant dense<0.000000e+00> : vector<16x64xf32>
    %27 = tpu.matmul %25, %26, %cst_11 {dimension_numbers = #tpu.dot_dimension_numbers<[1], [0], [0], [1], [0, 0, 1, 1], [], []>} : vector<16x32xbf16>, vector<32x64xbf16>, vector<16x64xf32> -> vector<16x64xf32>
    %c0_12 = arith.constant 0 : index
    %c0_13 = arith.constant 0 : index
    %28 = vector.load %arg5[%c0_12, %c0_13] : memref<1x64xf32, #tpu.memory_space<vmem>>, vector<1x64xf32>
    %29 = vector.broadcast %28 : vector<1x64xf32> to vector<16x64xf32>
    %30 = arith.addf %27, %29 : vector<16x64xf32>
    %cst_14 = arith.constant 5.000000e-01 : f32
    %31 = vector.broadcast %cst_14 : f32 to vector<16x64xf32>
    %32 = arith.mulf %31, %30 : vector<16x64xf32>
    %cst_15 = arith.constant 0.707106769 : f32
    %33 = vector.broadcast %cst_15 : f32 to vector<16x64xf32>
    %34 = arith.mulf %30, %33 : vector<16x64xf32>
    %35 = math.erf %34 : vector<16x64xf32>
    %cst_16 = arith.constant 1.000000e+00 : f32
    %36 = vector.broadcast %cst_16 : f32 to vector<16x64xf32>
    %37 = arith.addf %36, %35 : vector<16x64xf32>
    %38 = arith.mulf %32, %37 : vector<16x64xf32>
    %c0_17 = arith.constant 0 : index
    %c0_18 = arith.constant 0 : index
    %39 = vector.load %arg6[%c0_17, %c0_18] : memref<16x64xf32, #tpu.memory_space<vmem>>, vector<16x64xf32>
    tpu.vector_store %arg6[%c0_17, %c0_18], %38 {strides = array<i32>} : memref<16x64xf32, #tpu.memory_space<vmem>>, vector<16x64xf32>,
    return
  }
  func.func @transform_0(%arg0: i32) -> (i32, i32) {
    %c0_i32 = arith.constant 0 : i32
    %c0_i32_0 = arith.constant 0 : i32
    return %arg0, %c0_i32 : i32, i32
  }
  func.func @transform_1(%arg0: i32) -> (i32, i32) {
    %c0_i32 = arith.constant 0 : i32
    %c0_i32_0 = arith.constant 0 : i32
    %c0_i32_1 = arith.constant 0 : i32
    return %c0_i32, %c0_i32_0 : i32, i32
  }
  func.func @transform_2(%arg0: i32) -> (i32, i32) {
    %c0_i32 = arith.constant 0 : i32
    %c0_i32_0 = arith.constant 0 : i32
    %c0_i32_1 = arith.constant 0 : i32
    return %c0_i32, %c0_i32_0 : i32, i32
  }
  func.func @transform_3(%arg0: i32) -> (i32, i32) {
    %c0_i32 = arith.constant 0 : i32
    %c0_i32_0 = arith.constant 0 : i32
    %c0_i32_1 = arith.constant 0 : i32
    return %c0_i32, %c0_i32_0 : i32, i32
  }
  func.func @transform_4(%arg0: i32) -> (i32, i32) {
    %c0_i32 = arith.constant 0 : i32
    %c0_i32_0 = arith.constant 0 : i32
    %c0_i32_1 = arith.constant 0 : i32
    return %c0_i32, %c0_i32_0 : i32, i32
  }
  func.func @transform_5(%arg0: i32) -> (i32, i32) {
    %c0_i32 = arith.constant 0 : i32
    %c0_i32_0 = arith.constant 0 : i32
    return %arg0, %c0_i32 : i32, i32
  }
}

module attributes {stable_mosaic.version = 11 : i64} {
  func.func @_matmul_direct_kernel(%arg0: i32, %arg1: memref<16x64xf32, #tpu.memory_space<vmem>>, %arg2: memref<64x32xbf16, #tpu.memory_space<vmem>>, %arg3: memref<1x32xf32, #tpu.memory_space<vmem>>, %arg4: memref<16x32xf32, #tpu.memory_space<vmem>>, %arg5: memref<16x32xf32, #tpu.memory_space<vmem>>) attributes {dimension_semantics = [#tpu.dimension_semantics<parallel>], iteration_bounds = array<i64: 1>, scalar_prefetch = 0 : i64, scratch_operands = 0 : i64, tpu.core_type = #tpu.core_type<tc>, window_params = [{transform_indices = @transform_0, window_bounds = array<i64: 16, 64>}, {pipeline_mode = #tpu.pipeline_mode<synchronous>, transform_indices = @transform_1, window_bounds = array<i64: 64, 32>}, {pipeline_mode = #tpu.pipeline_mode<synchronous>, transform_indices = @transform_2, window_bounds = array<i64: 1, 32>}, {transform_indices = @transform_3, window_bounds = array<i64: 16, 32>}, {transform_indices = @transform_4, window_bounds = array<i64: 16, 32>}]} {
    %c0 = arith.constant 0 : index
    %c0_0 = arith.constant 0 : index
    %0 = vector.load %arg1[%c0, %c0_0] : memref<16x64xf32, #tpu.memory_space<vmem>>, vector<16x64xf32>
    %1 = arith.truncf %0 : vector<16x64xf32> to vector<16x64xbf16>
    %c0_1 = arith.constant 0 : index
    %c0_2 = arith.constant 0 : index
    %2 = vector.load %arg2[%c0_1, %c0_2] : memref<64x32xbf16, #tpu.memory_space<vmem>>, vector<64x32xbf16>
    %cst = arith.constant dense<0.000000e+00> : vector<16x32xf32>
    %3 = tpu.matmul %1, %2, %cst {dimension_numbers = #tpu.dot_dimension_numbers<[1], [0], [0], [1], [0, 0, 1, 1], [], []>} : vector<16x64xbf16>, vector<64x32xbf16>, vector<16x32xf32> -> vector<16x32xf32>
    %c0_3 = arith.constant 0 : index
    %c0_4 = arith.constant 0 : index
    %4 = vector.load %arg3[%c0_3, %c0_4] : memref<1x32xf32, #tpu.memory_space<vmem>>, vector<1x32xf32>
    %5 = vector.broadcast %4 : vector<1x32xf32> to vector<16x32xf32>
    %6 = arith.addf %3, %5 : vector<16x32xf32>
    %c0_5 = arith.constant 0 : index
    %c0_6 = arith.constant 0 : index
    %7 = vector.load %arg4[%c0_5, %c0_6] : memref<16x32xf32, #tpu.memory_space<vmem>>, vector<16x32xf32>
    %8 = arith.addf %6, %7 : vector<16x32xf32>
    %c0_7 = arith.constant 0 : index
    %c0_8 = arith.constant 0 : index
    %9 = vector.load %arg5[%c0_7, %c0_8] : memref<16x32xf32, #tpu.memory_space<vmem>>, vector<16x32xf32>
    tpu.vector_store %arg5[%c0_7, %c0_8], %8 {strides = array<i32>} : memref<16x32xf32, #tpu.memory_space<vmem>>, vector<16x32xf32>,
    return
  }
  func.func @transform_0(%arg0: i32) -> (i32, i32) {
    %c0_i32 = arith.constant 0 : i32
    %c0_i32_0 = arith.constant 0 : i32
    return %arg0, %c0_i32 : i32, i32
  }
  func.func @transform_1(%arg0: i32) -> (i32, i32) {
    %c0_i32 = arith.constant 0 : i32
    %c0_i32_0 = arith.constant 0 : i32
    %c0_i32_1 = arith.constant 0 : i32
    return %c0_i32, %c0_i32_0 : i32, i32
  }
  func.func @transform_2(%arg0: i32) -> (i32, i32) {
    %c0_i32 = arith.constant 0 : i32
    %c0_i32_0 = arith.constant 0 : i32
    %c0_i32_1 = arith.constant 0 : i32
    return %c0_i32, %c0_i32_0 : i32, i32
  }
  func.func @transform_3(%arg0: i32) -> (i32, i32) {
    %c0_i32 = arith.constant 0 : i32
    %c0_i32_0 = arith.constant 0 : i32
    return %arg0, %c0_i32 : i32, i32
  }
  func.func @transform_4(%arg0: i32) -> (i32, i32) {
    %c0_i32 = arith.constant 0 : i32
    %c0_i32_0 = arith.constant 0 : i32
    return %arg0, %c0_i32 : i32, i32
  }
}

module attributes {stable_mosaic.version = 11 : i64} {
  func.func @_matmul_direct_kernel(%arg0: i32, %arg1: memref<16x32xf32, #tpu.memory_space<vmem>>, %arg2: memref<32x128xbf16, #tpu.memory_space<vmem>>, %arg3: memref<1x128xf32, #tpu.memory_space<vmem>>, %arg4: memref<16x128xf32, #tpu.memory_space<vmem>>) attributes {dimension_semantics = [#tpu.dimension_semantics<parallel>], iteration_bounds = array<i64: 1>, scalar_prefetch = 0 : i64, scratch_operands = 0 : i64, tpu.core_type = #tpu.core_type<tc>, window_params = [{transform_indices = @transform_0, window_bounds = array<i64: 16, 32>}, {pipeline_mode = #tpu.pipeline_mode<synchronous>, transform_indices = @transform_1, window_bounds = array<i64: 32, 128>}, {pipeline_mode = #tpu.pipeline_mode<synchronous>, transform_indices = @transform_2, window_bounds = array<i64: 1, 128>}, {transform_indices = @transform_3, window_bounds = array<i64: 16, 128>}]} {
    %c0 = arith.constant 0 : index
    %c0_0 = arith.constant 0 : index
    %0 = vector.load %arg1[%c0, %c0_0] : memref<16x32xf32, #tpu.memory_space<vmem>>, vector<16x32xf32>
    %1 = arith.truncf %0 : vector<16x32xf32> to vector<16x32xbf16>
    %c0_1 = arith.constant 0 : index
    %c0_2 = arith.constant 0 : index
    %2 = vector.load %arg2[%c0_1, %c0_2] : memref<32x128xbf16, #tpu.memory_space<vmem>>, vector<32x128xbf16>
    %cst = arith.constant dense<0.000000e+00> : vector<16x128xf32>
    %3 = tpu.matmul %1, %2, %cst {dimension_numbers = #tpu.dot_dimension_numbers<[1], [0], [0], [1], [0, 0, 1, 1], [], []>} : vector<16x32xbf16>, vector<32x128xbf16>, vector<16x128xf32> -> vector<16x128xf32>
    %c0_3 = arith.constant 0 : index
    %c0_4 = arith.constant 0 : index
    %4 = vector.load %arg3[%c0_3, %c0_4] : memref<1x128xf32, #tpu.memory_space<vmem>>, vector<1x128xf32>
    %5 = vector.broadcast %4 : vector<1x128xf32> to vector<16x128xf32>
    %6 = arith.addf %3, %5 : vector<16x128xf32>
    %c0_5 = arith.constant 0 : index
    %c0_6 = arith.constant 0 : index
    %7 = vector.load %arg4[%c0_5, %c0_6] : memref<16x128xf32, #tpu.memory_space<vmem>>, vector<16x128xf32>
    tpu.vector_store %arg4[%c0_5, %c0_6], %6 {strides = array<i32>} : memref<16x128xf32, #tpu.memory_space<vmem>>, vector<16x128xf32>,
    return
  }
  func.func @transform_0(%arg0: i32) -> (i32, i32) {
    %c0_i32 = arith.constant 0 : i32
    %c0_i32_0 = arith.constant 0 : i32
    return %arg0, %c0_i32 : i32, i32
  }
  func.func @transform_1(%arg0: i32) -> (i32, i32) {
    %c0_i32 = arith.constant 0 : i32
    %c0_i32_0 = arith.constant 0 : i32
    %c0_i32_1 = arith.constant 0 : i32
    return %c0_i32, %c0_i32_0 : i32, i32
  }
  func.func @transform_2(%arg0: i32) -> (i32, i32) {
    %c0_i32 = arith.constant 0 : i32
    %c0_i32_0 = arith.constant 0 : i32
    %c0_i32_1 = arith.constant 0 : i32
    return %c0_i32, %c0_i32_0 : i32, i32
  }
  func.func @transform_3(%arg0: i32) -> (i32, i32) {
    %c0_i32 = arith.constant 0 : i32
    %c0_i32_0 = arith.constant 0 : i32
    return %arg0, %c0_i32 : i32, i32
  }
}

module attributes {stable_mosaic.version = 11 : i64} {
  func.func @_ln_matmul_kernel(%arg0: i32, %arg1: memref<16x32xf32, #tpu.memory_space<vmem>>, %arg2: memref<1x32xf32, #tpu.memory_space<vmem>>, %arg3: memref<1x32xf32, #tpu.memory_space<vmem>>, %arg4: memref<32x32xbf16, #tpu.memory_space<vmem>>, %arg5: memref<1x32xf32, #tpu.memory_space<vmem>>, %arg6: memref<16x32xf32, #tpu.memory_space<vmem>>) attributes {dimension_semantics = [#tpu.dimension_semantics<parallel>], iteration_bounds = array<i64: 1>, scalar_prefetch = 0 : i64, scratch_operands = 0 : i64, tpu.core_type = #tpu.core_type<tc>, window_params = [{transform_indices = @transform_0, window_bounds = array<i64: 16, 32>}, {pipeline_mode = #tpu.pipeline_mode<synchronous>, transform_indices = @transform_1, window_bounds = array<i64: 1, 32>}, {pipeline_mode = #tpu.pipeline_mode<synchronous>, transform_indices = @transform_2, window_bounds = array<i64: 1, 32>}, {pipeline_mode = #tpu.pipeline_mode<synchronous>, transform_indices = @transform_3, window_bounds = array<i64: 32, 32>}, {pipeline_mode = #tpu.pipeline_mode<synchronous>, transform_indices = @transform_4, window_bounds = array<i64: 1, 32>}, {transform_indices = @transform_5, window_bounds = array<i64: 16, 32>}]} {
    %c0 = arith.constant 0 : index
    %c0_0 = arith.constant 0 : index
    %0 = vector.load %arg1[%c0, %c0_0] : memref<16x32xf32, #tpu.memory_space<vmem>>, vector<16x32xf32>
    %cst = arith.constant dense<0.000000e+00> : vector<16xf32>
    %1 = vector.multi_reduction <add>, %0, %cst [1] : vector<16x32xf32> to vector<16xf32>
    %2 = vector.shape_cast %1 : vector<16xf32> to vector<16x1xf32>
    %cst_1 = arith.constant 3.200000e+01 : f32
    %3 = vector.broadcast %cst_1 : f32 to vector<16x1xf32>
    %4 = arith.divf %2, %3 : vector<16x1xf32>
    %5 = vector.broadcast %4 : vector<16x1xf32> to vector<16x32xf32>
    %6 = arith.subf %0, %5 : vector<16x32xf32>
    %7 = arith.mulf %6, %6 : vector<16x32xf32>
    %cst_2 = arith.constant dense<0.000000e+00> : vector<16xf32>
    %8 = vector.multi_reduction <add>, %7, %cst_2 [1] : vector<16x32xf32> to vector<16xf32>
    %9 = vector.shape_cast %8 : vector<16xf32> to vector<16x1xf32>
    %cst_3 = arith.constant 3.200000e+01 : f32
    %10 = vector.broadcast %cst_3 : f32 to vector<16x1xf32>
    %11 = arith.divf %9, %10 : vector<16x1xf32>
    %12 = vector.broadcast %4 : vector<16x1xf32> to vector<16x32xf32>
    %13 = arith.subf %0, %12 : vector<16x32xf32>
    %cst_4 = arith.constant 9.99999974E-6 : f32
    %14 = vector.broadcast %cst_4 : f32 to vector<16x1xf32>
    %15 = arith.addf %11, %14 : vector<16x1xf32>
    %16 = math.rsqrt %15 : vector<16x1xf32>
    %17 = vector.broadcast %16 : vector<16x1xf32> to vector<16x32xf32>
    %18 = arith.mulf %13, %17 : vector<16x32xf32>
    %c0_5 = arith.constant 0 : index
    %c0_6 = arith.constant 0 : index
    %19 = vector.load %arg2[%c0_5, %c0_6] : memref<1x32xf32, #tpu.memory_space<vmem>>, vector<1x32xf32>
    %20 = vector.broadcast %19 : vector<1x32xf32> to vector<16x32xf32>
    %21 = arith.mulf %18, %20 : vector<16x32xf32>
    %c0_7 = arith.constant 0 : index
    %c0_8 = arith.constant 0 : index
    %22 = vector.load %arg3[%c0_7, %c0_8] : memref<1x32xf32, #tpu.memory_space<vmem>>, vector<1x32xf32>
    %23 = vector.broadcast %22 : vector<1x32xf32> to vector<16x32xf32>
    %24 = arith.addf %21, %23 : vector<16x32xf32>
    %25 = arith.truncf %24 : vector<16x32xf32> to vector<16x32xbf16>
    %c0_9 = arith.constant 0 : index
    %c0_10 = arith.constant 0 : index
    %26 = vector.load %arg4[%c0_9, %c0_10] : memref<32x32xbf16, #tpu.memory_space<vmem>>, vector<32x32xbf16>
    %cst_11 = arith.constant dense<0.000000e+00> : vector<16x32xf32>
    %27 = tpu.matmul %25, %26, %cst_11 {dimension_numbers = #tpu.dot_dimension_numbers<[1], [0], [0], [1], [0, 0, 1, 1], [], []>} : vector<16x32xbf16>, vector<32x32xbf16>, vector<16x32xf32> -> vector<16x32xf32>
    %c0_12 = arith.constant 0 : index
    %c0_13 = arith.constant 0 : index
    %28 = vector.load %arg5[%c0_12, %c0_13] : memref<1x32xf32, #tpu.memory_space<vmem>>, vector<1x32xf32>
    %29 = vector.broadcast %28 : vector<1x32xf32> to vector<16x32xf32>
    %30 = arith.addf %27, %29 : vector<16x32xf32>
    %c0_14 = arith.constant 0 : index
    %c0_15 = arith.constant 0 : index
    %31 = vector.load %arg6[%c0_14, %c0_15] : memref<16x32xf32, #tpu.memory_space<vmem>>, vector<16x32xf32>
    tpu.vector_store %arg6[%c0_14, %c0_15], %30 {strides = array<i32>} : memref<16x32xf32, #tpu.memory_space<vmem>>, vector<16x32xf32>,
    return
  }
  func.func @transform_0(%arg0: i32) -> (i32, i32) {
    %c0_i32 = arith.constant 0 : i32
    %c0_i32_0 = arith.constant 0 : i32
    return %arg0, %c0_i32 : i32, i32
  }
  func.func @transform_1(%arg0: i32) -> (i32, i32) {
    %c0_i32 = arith.constant 0 : i32
    %c0_i32_0 = arith.constant 0 : i32
    %c0_i32_1 = arith.constant 0 : i32
    return %c0_i32, %c0_i32_0 : i32, i32
  }
  func.func @transform_2(%arg0: i32) -> (i32, i32) {
    %c0_i32 = arith.constant 0 : i32
    %c0_i32_0 = arith.constant 0 : i32
    %c0_i32_1 = arith.constant 0 : i32
    return %c0_i32, %c0_i32_0 : i32, i32
  }
  func.func @transform_3(%arg0: i32) -> (i32, i32) {
    %c0_i32 = arith.constant 0 : i32
    %c0_i32_0 = arith.constant 0 : i32
    %c0_i32_1 = arith.constant 0 : i32
    return %c0_i32, %c0_i32_0 : i32, i32
  }
  func.func @transform_4(%arg0: i32) -> (i32, i32) {
    %c0_i32 = arith.constant 0 : i32
    %c0_i32_0 = arith.constant 0 : i32
    %c0_i32_1 = arith.constant 0 : i32
    return %c0_i32, %c0_i32_0 : i32, i32
  }
  func.func @transform_5(%arg0: i32) -> (i32, i32) {
    %c0_i32 = arith.constant 0 : i32
    %c0_i32_0 = arith.constant 0 : i32
    return %arg0, %c0_i32 : i32, i32
  }
}

module attributes {stable_mosaic.version = 11 : i64} {
  func.func @_cross_attn_kernel(%arg0: i32, %arg1: memref<1x8x32xf32, #tpu.memory_space<vmem>>, %arg2: memref<1x8x64xf32, #tpu.memory_space<vmem>>, %arg3: memref<1x8x32xf32, #tpu.memory_space<vmem>>) attributes {dimension_semantics = [#tpu.dimension_semantics<parallel>], iteration_bounds = array<i64: 2>, scalar_prefetch = 0 : i64, scratch_operands = 0 : i64, tpu.core_type = #tpu.core_type<tc>, window_params = [{transform_indices = @transform_0, window_bounds = array<i64: 1, 8, 32>}, {transform_indices = @transform_1, window_bounds = array<i64: 1, 8, 64>}, {transform_indices = @transform_2, window_bounds = array<i64: 1, 8, 32>}]} {
    %c0 = arith.constant 0 : index
    %c0_0 = arith.constant 0 : index
    %c0_1 = arith.constant 0 : index
    %0 = vector.load %arg1[%c0, %c0_0, %c0_1] : memref<1x8x32xf32, #tpu.memory_space<vmem>>, vector<1x8x8xf32>
    %1 = vector.shape_cast %0 : vector<1x8x8xf32> to vector<8x8xf32>
    %cst = arith.constant 0.353553385 : f32
    %2 = vector.broadcast %cst : f32 to vector<8x8xf32>
    %3 = arith.mulf %1, %2 : vector<8x8xf32>
    %c0_2 = arith.constant 0 : index
    %c0_3 = arith.constant 0 : index
    %c0_4 = arith.constant 0 : index
    %4 = vector.load %arg2[%c0_2, %c0_3, %c0_4] : memref<1x8x64xf32, #tpu.memory_space<vmem>>, vector<1x8x8xf32>
    %5 = vector.shape_cast %4 : vector<1x8x8xf32> to vector<8x8xf32>
    %c0_5 = arith.constant 0 : index
    %c0_6 = arith.constant 0 : index
    %c32 = arith.constant 32 : index
    %6 = vector.load %arg2[%c0_5, %c0_6, %c32] : memref<1x8x64xf32, #tpu.memory_space<vmem>>, vector<1x8x8xf32>
    %7 = vector.shape_cast %6 : vector<1x8x8xf32> to vector<8x8xf32>
    %8 = arith.truncf %3 : vector<8x8xf32> to vector<8x8xbf16>
    %9 = arith.truncf %5 : vector<8x8xf32> to vector<8x8xbf16>
    %cst_7 = arith.constant dense<0.000000e+00> : vector<8x8xf32>
    %10 = tpu.matmul %8, %9, %cst_7 {dimension_numbers = #tpu.dot_dimension_numbers<[1], [1], [0], [0], [0, 0, 1, 0], [], []>} : vector<8x8xbf16>, vector<8x8xbf16>, vector<8x8xf32> -> vector<8x8xf32>
    %cst_8 = arith.constant dense<0xFF800000> : vector<8xf32>
    %11 = vector.multi_reduction <maximumf>, %10, %cst_8 [1] : vector<8x8xf32> to vector<8xf32>
    %12 = vector.shape_cast %11 : vector<8xf32> to vector<8x1xf32>
    %13 = vector.broadcast %12 : vector<8x1xf32> to vector<8x8xf32>
    %14 = arith.subf %10, %13 : vector<8x8xf32>
    %15 = math.exp %14 : vector<8x8xf32>
    %cst_9 = arith.constant dense<0.000000e+00> : vector<8xf32>
    %16 = vector.multi_reduction <add>, %15, %cst_9 [1] : vector<8x8xf32> to vector<8xf32>
    %17 = vector.shape_cast %16 : vector<8xf32> to vector<8x1xf32>
    %18 = arith.truncf %15 : vector<8x8xf32> to vector<8x8xbf16>
    %19 = arith.truncf %7 : vector<8x8xf32> to vector<8x8xbf16>
    %cst_10 = arith.constant dense<0.000000e+00> : vector<8x8xf32>
    %20 = tpu.matmul %18, %19, %cst_10 {dimension_numbers = #tpu.dot_dimension_numbers<[1], [0], [0], [1], [0, 0, 1, 1], [], []>} : vector<8x8xbf16>, vector<8x8xbf16>, vector<8x8xf32> -> vector<8x8xf32>
    %21 = vector.broadcast %17 : vector<8x1xf32> to vector<8x8xf32>
    %22 = arith.divf %20, %21 : vector<8x8xf32>
    %c0_11 = arith.constant 0 : index
    %c0_12 = arith.constant 0 : index
    %c0_13 = arith.constant 0 : index
    %23 = vector.load %arg3[%c0_11, %c0_12, %c0_13] : memref<1x8x32xf32, #tpu.memory_space<vmem>>, vector<1x8x8xf32>
    %24 = vector.shape_cast %23 : vector<1x8x8xf32> to vector<8x8xf32>
    %25 = vector.shape_cast %22 : vector<8x8xf32> to vector<1x8x8xf32>
    tpu.vector_store %arg3[%c0_11, %c0_12, %c0_13], %25 {strides = array<i32>} : memref<1x8x32xf32, #tpu.memory_space<vmem>>, vector<1x8x8xf32>,
    %c0_14 = arith.constant 0 : index
    %c0_15 = arith.constant 0 : index
    %c8 = arith.constant 8 : index
    %26 = vector.load %arg1[%c0_14, %c0_15, %c8] : memref<1x8x32xf32, #tpu.memory_space<vmem>>, vector<1x8x8xf32>
    %27 = vector.shape_cast %26 : vector<1x8x8xf32> to vector<8x8xf32>
    %cst_16 = arith.constant 0.353553385 : f32
    %28 = vector.broadcast %cst_16 : f32 to vector<8x8xf32>
    %29 = arith.mulf %27, %28 : vector<8x8xf32>
    %c0_17 = arith.constant 0 : index
    %c0_18 = arith.constant 0 : index
    %c8_19 = arith.constant 8 : index
    %30 = vector.load %arg2[%c0_17, %c0_18, %c8_19] : memref<1x8x64xf32, #tpu.memory_space<vmem>>, vector<1x8x8xf32>
    %31 = vector.shape_cast %30 : vector<1x8x8xf32> to vector<8x8xf32>
    %c0_20 = arith.constant 0 : index
    %c0_21 = arith.constant 0 : index
    %c40 = arith.constant 40 : index
    %32 = vector.load %arg2[%c0_20, %c0_21, %c40] : memref<1x8x64xf32, #tpu.memory_space<vmem>>, vector<1x8x8xf32>
    %33 = vector.shape_cast %32 : vector<1x8x8xf32> to vector<8x8xf32>
    %34 = arith.truncf %29 : vector<8x8xf32> to vector<8x8xbf16>
    %35 = arith.truncf %31 : vector<8x8xf32> to vector<8x8xbf16>
    %cst_22 = arith.constant dense<0.000000e+00> : vector<8x8xf32>
    %36 = tpu.matmul %34, %35, %cst_22 {dimension_numbers = #tpu.dot_dimension_numbers<[1], [1], [0], [0], [0, 0, 1, 0], [], []>} : vector<8x8xbf16>, vector<8x8xbf16>, vector<8x8xf32> -> vector<8x8xf32>
    %cst_23 = arith.constant dense<0xFF800000> : vector<8xf32>
    %37 = vector.multi_reduction <maximumf>, %36, %cst_23 [1] : vector<8x8xf32> to vector<8xf32>
    %38 = vector.shape_cast %37 : vector<8xf32> to vector<8x1xf32>
    %39 = vector.broadcast %38 : vector<8x1xf32> to vector<8x8xf32>
    %40 = arith.subf %36, %39 : vector<8x8xf32>
    %41 = math.exp %40 : vector<8x8xf32>
    %cst_24 = arith.constant dense<0.000000e+00> : vector<8xf32>
    %42 = vector.multi_reduction <add>, %41, %cst_24 [1] : vector<8x8xf32> to vector<8xf32>
    %43 = vector.shape_cast %42 : vector<8xf32> to vector<8x1xf32>
    %44 = arith.truncf %41 : vector<8x8xf32> to vector<8x8xbf16>
    %45 = arith.truncf %33 : vector<8x8xf32> to vector<8x8xbf16>
    %cst_25 = arith.constant dense<0.000000e+00> : vector<8x8xf32>
    %46 = tpu.matmul %44, %45, %cst_25 {dimension_numbers = #tpu.dot_dimension_numbers<[1], [0], [0], [1], [0, 0, 1, 1], [], []>} : vector<8x8xbf16>, vector<8x8xbf16>, vector<8x8xf32> -> vector<8x8xf32>
    %47 = vector.broadcast %43 : vector<8x1xf32> to vector<8x8xf32>
    %48 = arith.divf %46, %47 : vector<8x8xf32>
    %c0_26 = arith.constant 0 : index
    %c0_27 = arith.constant 0 : index
    %c8_28 = arith.constant 8 : index
    %49 = vector.load %arg3[%c0_26, %c0_27, %c8_28] : memref<1x8x32xf32, #tpu.memory_space<vmem>>, vector<1x8x8xf32>
    %50 = vector.shape_cast %49 : vector<1x8x8xf32> to vector<8x8xf32>
    %51 = vector.shape_cast %48 : vector<8x8xf32> to vector<1x8x8xf32>
    tpu.vector_store %arg3[%c0_26, %c0_27, %c8_28], %51 {strides = array<i32>} : memref<1x8x32xf32, #tpu.memory_space<vmem>>, vector<1x8x8xf32>,
    %c0_29 = arith.constant 0 : index
    %c0_30 = arith.constant 0 : index
    %c16 = arith.constant 16 : index
    %52 = vector.load %arg1[%c0_29, %c0_30, %c16] : memref<1x8x32xf32, #tpu.memory_space<vmem>>, vector<1x8x8xf32>
    %53 = vector.shape_cast %52 : vector<1x8x8xf32> to vector<8x8xf32>
    %cst_31 = arith.constant 0.353553385 : f32
    %54 = vector.broadcast %cst_31 : f32 to vector<8x8xf32>
    %55 = arith.mulf %53, %54 : vector<8x8xf32>
    %c0_32 = arith.constant 0 : index
    %c0_33 = arith.constant 0 : index
    %c16_34 = arith.constant 16 : index
    %56 = vector.load %arg2[%c0_32, %c0_33, %c16_34] : memref<1x8x64xf32, #tpu.memory_space<vmem>>, vector<1x8x8xf32>
    %57 = vector.shape_cast %56 : vector<1x8x8xf32> to vector<8x8xf32>
    %c0_35 = arith.constant 0 : index
    %c0_36 = arith.constant 0 : index
    %c48 = arith.constant 48 : index
    %58 = vector.load %arg2[%c0_35, %c0_36, %c48] : memref<1x8x64xf32, #tpu.memory_space<vmem>>, vector<1x8x8xf32>
    %59 = vector.shape_cast %58 : vector<1x8x8xf32> to vector<8x8xf32>
    %60 = arith.truncf %55 : vector<8x8xf32> to vector<8x8xbf16>
    %61 = arith.truncf %57 : vector<8x8xf32> to vector<8x8xbf16>
    %cst_37 = arith.constant dense<0.000000e+00> : vector<8x8xf32>
    %62 = tpu.matmul %60, %61, %cst_37 {dimension_numbers = #tpu.dot_dimension_numbers<[1], [1], [0], [0], [0, 0, 1, 0], [], []>} : vector<8x8xbf16>, vector<8x8xbf16>, vector<8x8xf32> -> vector<8x8xf32>
    %cst_38 = arith.constant dense<0xFF800000> : vector<8xf32>
    %63 = vector.multi_reduction <maximumf>, %62, %cst_38 [1] : vector<8x8xf32> to vector<8xf32>
    %64 = vector.shape_cast %63 : vector<8xf32> to vector<8x1xf32>
    %65 = vector.broadcast %64 : vector<8x1xf32> to vector<8x8xf32>
    %66 = arith.subf %62, %65 : vector<8x8xf32>
    %67 = math.exp %66 : vector<8x8xf32>
    %cst_39 = arith.constant dense<0.000000e+00> : vector<8xf32>
    %68 = vector.multi_reduction <add>, %67, %cst_39 [1] : vector<8x8xf32> to vector<8xf32>
    %69 = vector.shape_cast %68 : vector<8xf32> to vector<8x1xf32>
    %70 = arith.truncf %67 : vector<8x8xf32> to vector<8x8xbf16>
    %71 = arith.truncf %59 : vector<8x8xf32> to vector<8x8xbf16>
    %cst_40 = arith.constant dense<0.000000e+00> : vector<8x8xf32>
    %72 = tpu.matmul %70, %71, %cst_40 {dimension_numbers = #tpu.dot_dimension_numbers<[1], [0], [0], [1], [0, 0, 1, 1], [], []>} : vector<8x8xbf16>, vector<8x8xbf16>, vector<8x8xf32> -> vector<8x8xf32>
    %73 = vector.broadcast %69 : vector<8x1xf32> to vector<8x8xf32>
    %74 = arith.divf %72, %73 : vector<8x8xf32>
    %c0_41 = arith.constant 0 : index
    %c0_42 = arith.constant 0 : index
    %c16_43 = arith.constant 16 : index
    %75 = vector.load %arg3[%c0_41, %c0_42, %c16_43] : memref<1x8x32xf32, #tpu.memory_space<vmem>>, vector<1x8x8xf32>
    %76 = vector.shape_cast %75 : vector<1x8x8xf32> to vector<8x8xf32>
    %77 = vector.shape_cast %74 : vector<8x8xf32> to vector<1x8x8xf32>
    tpu.vector_store %arg3[%c0_41, %c0_42, %c16_43], %77 {strides = array<i32>} : memref<1x8x32xf32, #tpu.memory_space<vmem>>, vector<1x8x8xf32>,
    %c0_44 = arith.constant 0 : index
    %c0_45 = arith.constant 0 : index
    %c24 = arith.constant 24 : index
    %78 = vector.load %arg1[%c0_44, %c0_45, %c24] : memref<1x8x32xf32, #tpu.memory_space<vmem>>, vector<1x8x8xf32>
    %79 = vector.shape_cast %78 : vector<1x8x8xf32> to vector<8x8xf32>
    %cst_46 = arith.constant 0.353553385 : f32
    %80 = vector.broadcast %cst_46 : f32 to vector<8x8xf32>
    %81 = arith.mulf %79, %80 : vector<8x8xf32>
    %c0_47 = arith.constant 0 : index
    %c0_48 = arith.constant 0 : index
    %c24_49 = arith.constant 24 : index
    %82 = vector.load %arg2[%c0_47, %c0_48, %c24_49] : memref<1x8x64xf32, #tpu.memory_space<vmem>>, vector<1x8x8xf32>
    %83 = vector.shape_cast %82 : vector<1x8x8xf32> to vector<8x8xf32>
    %c0_50 = arith.constant 0 : index
    %c0_51 = arith.constant 0 : index
    %c56 = arith.constant 56 : index
    %84 = vector.load %arg2[%c0_50, %c0_51, %c56] : memref<1x8x64xf32, #tpu.memory_space<vmem>>, vector<1x8x8xf32>
    %85 = vector.shape_cast %84 : vector<1x8x8xf32> to vector<8x8xf32>
    %86 = arith.truncf %81 : vector<8x8xf32> to vector<8x8xbf16>
    %87 = arith.truncf %83 : vector<8x8xf32> to vector<8x8xbf16>
    %cst_52 = arith.constant dense<0.000000e+00> : vector<8x8xf32>
    %88 = tpu.matmul %86, %87, %cst_52 {dimension_numbers = #tpu.dot_dimension_numbers<[1], [1], [0], [0], [0, 0, 1, 0], [], []>} : vector<8x8xbf16>, vector<8x8xbf16>, vector<8x8xf32> -> vector<8x8xf32>
    %cst_53 = arith.constant dense<0xFF800000> : vector<8xf32>
    %89 = vector.multi_reduction <maximumf>, %88, %cst_53 [1] : vector<8x8xf32> to vector<8xf32>
    %90 = vector.shape_cast %89 : vector<8xf32> to vector<8x1xf32>
    %91 = vector.broadcast %90 : vector<8x1xf32> to vector<8x8xf32>
    %92 = arith.subf %88, %91 : vector<8x8xf32>
    %93 = math.exp %92 : vector<8x8xf32>
    %cst_54 = arith.constant dense<0.000000e+00> : vector<8xf32>
    %94 = vector.multi_reduction <add>, %93, %cst_54 [1] : vector<8x8xf32> to vector<8xf32>
    %95 = vector.shape_cast %94 : vector<8xf32> to vector<8x1xf32>
    %96 = arith.truncf %93 : vector<8x8xf32> to vector<8x8xbf16>
    %97 = arith.truncf %85 : vector<8x8xf32> to vector<8x8xbf16>
    %cst_55 = arith.constant dense<0.000000e+00> : vector<8x8xf32>
    %98 = tpu.matmul %96, %97, %cst_55 {dimension_numbers = #tpu.dot_dimension_numbers<[1], [0], [0], [1], [0, 0, 1, 1], [], []>} : vector<8x8xbf16>, vector<8x8xbf16>, vector<8x8xf32> -> vector<8x8xf32>
    %99 = vector.broadcast %95 : vector<8x1xf32> to vector<8x8xf32>
    %100 = arith.divf %98, %99 : vector<8x8xf32>
    %c0_56 = arith.constant 0 : index
    %c0_57 = arith.constant 0 : index
    %c24_58 = arith.constant 24 : index
    %101 = vector.load %arg3[%c0_56, %c0_57, %c24_58] : memref<1x8x32xf32, #tpu.memory_space<vmem>>, vector<1x8x8xf32>
    %102 = vector.shape_cast %101 : vector<1x8x8xf32> to vector<8x8xf32>
    %103 = vector.shape_cast %100 : vector<8x8xf32> to vector<1x8x8xf32>
    tpu.vector_store %arg3[%c0_56, %c0_57, %c24_58], %103 {strides = array<i32>} : memref<1x8x32xf32, #tpu.memory_space<vmem>>, vector<1x8x8xf32>,
    return
  }
  func.func @transform_0(%arg0: i32) -> (i32, i32, i32) {
    %c0_i32 = arith.constant 0 : i32
    %c0_i32_0 = arith.constant 0 : i32
    %c0_i32_1 = arith.constant 0 : i32
    return %arg0, %c0_i32, %c0_i32_0 : i32, i32, i32
  }
  func.func @transform_1(%arg0: i32) -> (i32, i32, i32) {
    %c0_i32 = arith.constant 0 : i32
    %c0_i32_0 = arith.constant 0 : i32
    %c0_i32_1 = arith.constant 0 : i32
    return %arg0, %c0_i32, %c0_i32_0 : i32, i32, i32
  }
  func.func @transform_2(%arg0: i32) -> (i32, i32, i32) {
    %c0_i32 = arith.constant 0 : i32
    %c0_i32_0 = arith.constant 0 : i32
    %c0_i32_1 = arith.constant 0 : i32
    return %arg0, %c0_i32, %c0_i32_0 : i32, i32, i32
  }
}

</mosaic_0001>

<bundles_post_ra>
// kernel: chemformer_forward.30
= control target key start
LH: loop header
LB: loop body
LE: loop exit
PB: predicated region body
PF: predicated region fallthrough
CT: control target
= control target key end

     0   :  { %vm41_vm0 = vcmask 261120   ;;  %s133_s1 = inlined_call_operand.vmem [shape: bf16[32,32], index: 1, kind: input, shape index: {}]   ;;  %s134_s0 = inlined_call_operand.vmem [shape: f32[16,32], index: 0, kind: input, shape index: {}]   ;;  %s135_s2 = inlined_call_operand.vmem [shape: f32[1,32], index: 2, kind: input, shape index: {}]   ;;  %s136_s3 = inlined_call_operand.vmem [shape: f32[16,32], index: 3, kind: input, shape index: {}]   ;;  %s137_s4 = inlined_call_operand.vmem [shape: f32[16,32], index: 4, kind: output, shape index: {}]  }
   0x1   :  { %v79_v0 = vld [vmem:[%s133_s1 + $0x8] sm:$0xff]  ;;  %v78_v1 = vld [vmem:[%s133_s1] sm:$0xff] }
   0x2   :  { %51 = vmatpush.bf16.msra.mxu0 %v79_v0  ;;  %v18_v2 = vld [vmem:[%s134_s0] sm:$0xff]  ;;  %v19_v3 = vld [vmem:[%s134_s0 + $0x8] sm:$0xff] }
   0x3   :  { %v20_v4 = vpack.c.bf16 %v19_v3, %v18_v2  ;;  %v80_v5 = vld [vmem:[%s135_s2] ss:$0 sm:$0xff]  ;;  %v60_v11 = vld [vmem:[%s136_s3 + $0x8] sm:$0xff] }
   0x4   :  { %v59_v7 = vld [vmem:[%s136_s3] sm:$0xff] }
   0x6   :  { %52 = vmatpush.bf16.msra.mxu0 %v78_v1 }
   0x9   :  { %77 = vmatmul.msk.bf16.vlgmr.msra.gmra.mxu0 %vm41_vm0, %v20_v4 }
  0x86   :  { %v54_v6 = vpop.f32.mrf.mxu0 }
  0x87   :  { %v55_v8 = vadd.f32 %v80_v5, %v54_v6 }
  0x89   :  { %v61_v9 = vadd.f32 %v59_v7, %v55_v8 }
  0x8b   :  { %63 = vst.msk [vmem:[%s137_s4] sm:$0xff] %vm41_vm0, %v61_v9 }
  0x8e   :  { %v56_v10 = vpop.f32.mrf.mxu0 }
  0x8f   :  { %v57_v12 = vadd.f32 %v80_v5, %v56_v10 }
  0x91   :  { %v62_v13 = vadd.f32 %v60_v11, %v57_v12 }
  0x93   :  { %64 = vst.msk [vmem:[%s137_s4 + $0x8] sm:$0xff] %vm41_vm0, %v62_v13 }

// kernel: chemformer_forward.31
= control target key start
LH: loop header
LB: loop body
LE: loop exit
PB: predicated region body
PF: predicated region fallthrough
CT: control target
= control target key end

     0   :  { %vm23_vm0 = vcmask 261120   ;;  %v247_v4 = vmov 32.0   ;;  %vm213_vm13 = vcmask 523264   ;;  %s325_s0 = inlined_call_operand.vmem [shape: f32[16,32], index: 0, kind: input, shape index: {}]   ;;  %s326_s1 = inlined_call_operand.vmem [shape: f32[1,32], index: 1, kind: input, shape index: {}]   ;;  %s327_s2 = inlined_call_operand.vmem [shape: f32[1,32], index: 2, kind: input, shape index: {}]   ;;  %s328_s4 = inlined_call_operand.vmem [shape: f32[1,64], index: 4, kind: input, shape index: {}]   ;;  %s329_s3 = inlined_call_operand.vmem [shape: bf16[32,64], index: 3, kind: input, shape index: {}]   ;;  %s330_s5 = inlined_call_operand.vmem [shape: f32[16,64], index: 5, kind: output, shape index: {}]  }
   0x1   :  { %v21_v0 = vld [vmem:[%s325_s0] sm:$0xff]  ;;  %v22_v2 = vld [vmem:[%s325_s0 + $0x8] sm:$0xff]  ;;  %237 = vrcp.f32 %v247_v4 }
   0x2   :  { %v24_v1 = vsel %vm23_vm0, %v21_v0, 0.0  ;;  %v27_v3 = vsel %vm23_vm0, %v22_v2, 0.0  ;;  %v232_v21 = vld [vmem:[%s329_s3 + $0x8] sm:$0xff]  ;;  %v231_v23 = vld [vmem:[%s329_s3] sm:$0xff] }
   0x3   :  { %25 = vadd.xlane.f32.xlu0 %v24_v1  ;;  %117 = vmatpush.bf16.msra.mxu0 %v232_v21  ;;  %v234_v42 = vld [vmem:[%s326_s1] ss:$0 sm:$0xff] }
   0x4   :  { %v235_v47 = vld [vmem:[%s327_s2] ss:$0 sm:$0xff] }
   0x5   :  { %v236_v52 = vld [vmem:[%s328_s4] ss:$0 sm:$0xff] }
   0x7   :  { %v238_v5 = vpop.eup %237  ;;  %118 = vmatpush.bf16.msra.mxu0 %v231_v23 }
   0x8   :  { %v31_v6 = vmul.f32 32.0, %v238_v5  ;;  %vm35_vm1 = vweird.f32 %v238_v5 }
   0xa   :  { %v32_v7 = vsub.f32 1.0, %v31_v6 }
   0xb   :  { %28 = vadd.xlane.f32.xlu0 %v27_v3 }
   0xc   :  { %v33_v8 = vmul.f32 %v238_v5, %v32_v7 }
   0xe   :  { %v34_v9 = vadd.f32 %v238_v5, %v33_v8 }
  0x10   :  { %v36_v10 = vsel %vm35_vm1, %v238_v5, %v34_v9 }
  0x76   :  { %v26_v11 = vpop.xlane.xlu0 %25 }
  0x77   :  { %v37_v12 = vmul.f32 %v36_v10, %v26_v11 }
  0x79   :  { %v39_v13 = vsub.f32 %v21_v0, %v37_v12 }
  0x7b   :  { %v41_v14 = vmul.f32 %v39_v13, %v39_v13 }
  0x7d   :  { %v43_v15 = vsel %vm23_vm0, %v41_v14, 0.0 }
  0x7e   :  { %44 = vadd.xlane.f32.xlu1 %v43_v15  ;;  %v29_v16 = vpop.xlane.xlu0 %28 }
  0x7f   :  { %v38_v17 = vmul.f32 %v36_v10, %v29_v16 }
  0x81   :  { %v40_v18 = vsub.f32 %v22_v2, %v38_v17 }
  0x83   :  { %v42_v19 = vmul.f32 %v40_v18, %v40_v18 }
  0x85   :  { %v46_v20 = vsel %vm23_vm0, %v42_v19, 0.0 }
  0x86   :  { %47 = vadd.xlane.f32.xlu1 %v46_v20 }
  0xf1   :  { %v45_v22 = vpop.xlane.xlu1 %44 }
  0xf2   :  { %v49_v24 = vmul.f32 %v45_v22, %v36_v10 }
  0xf4   :  { %v51_v25 = vadd.f32 1e-05, %v49_v24 }
  0xf6   :  { %239 = vrsqrt.f32 %v51_v25  ;;  %vm59_vm3 = vweird.f32 %v51_v25 }
  0xf9   :  { %v48_v26 = vpop.xlane.xlu1 %47 }
  0xfa   :  { %v50_v27 = vmul.f32 %v48_v26, %v36_v10 }
  0xfc   :  { %v240_v28 = vpop.eup %239  ;;  %v52_v29 = vadd.f32 1e-05, %v50_v27 }
  0xfd   :  { %v54_v30 = vmul.f32 %v240_v28, %v51_v25  ;;  %vm60_vm2 = vweird.f32 %v240_v28 }
  0xfe   :  { %241 = vrsqrt.f32 %v52_v29  ;;  %vm61_vm4 = vmor %vm59_vm3, %vm60_vm2  ;;  %vm69_vm6 = vweird.f32 %v52_v29 }
  0xff   :  { %v55_v31 = vmul.f32 %v240_v28, %v54_v30 }
 0x101   :  { %v56_v32 = vmul.f32 0.5, %v55_v31 }
 0x103   :  { %v57_v33 = vsub.f32 1.5, %v56_v32 }
 0x104   :  { %v242_v34 = vpop.eup %241 }
 0x105   :  { %v58_v35 = vmul.f32 %v240_v28, %v57_v33  ;;  %v64_v36 = vmul.f32 %v242_v34, %v52_v29  ;;  %vm70_vm5 = vweird.f32 %v242_v34 }
 0x106   :  { %vm71_vm7 = vmor %vm69_vm6, %vm70_vm5 }
 0x107   :  { %v65_v37 = vmul.f32 %v242_v34, %v64_v36  ;;  %v62_v38 = vsel %vm61_vm4, %v240_v28, %v58_v35 }
 0x108   :  { %v73_v41 = vmul.f32 %v62_v38, %v39_v13 }
 0x109   :  { %v66_v39 = vmul.f32 0.5, %v65_v37 }
 0x10a   :  { %v79_v46 = vmul.f32 %v234_v42, %v73_v41 }
 0x10b   :  { %v67_v40 = vsub.f32 1.5, %v66_v39 }
 0x10c   :  { %v85_v49 = vadd.f32 %v235_v47, %v79_v46 }
 0x10d   :  { %v68_v43 = vmul.f32 %v242_v34, %v67_v40 }
 0x10f   :  { %v72_v44 = vsel %vm71_vm7, %v242_v34, %v68_v43 }
 0x110   :  { %v74_v45 = vmul.f32 %v72_v44, %v40_v18 }
 0x112   :  { %v80_v48 = vmul.f32 %v234_v42, %v74_v45 }
 0x114   :  { %v86_v50 = vadd.f32 %v235_v47, %v80_v48 }
 0x116   :  { %v87_v51 = vpack.c.bf16 %v86_v50, %v85_v49 }
 0x118   :  { %228 = vmatmul.msk.bf16.vlgmr.msra.gmra.mxu0 %vm23_vm0, %v87_v51 }
 0x195   :  { %v120_v53 = vpop.f32.mrf.mxu0 }
 0x196   :  { %v304_v54 = vadd.f32 %v236_v52, %v120_v53 }
 0x198   :  { %v127_v55 = vmul.f32 0.70710677, %v304_v54 }
 0x19a   :  { %v129_v56 = vmul.f32 %v127_v55, %v127_v55 }
 0x19c   :  { %v130_v57 = vmin.f32 %v129_v56, 16.0 }
 0x19d   :  { %v122_v58 = vpop.f32.mrf.mxu0 }
 0x19e   :  { %v131_v59 = vmul.f32 2.1237322e-06, %v130_v57  ;;  %v142_v60 = vmul.f32 3.8918573e-05, %v130_v57  ;;  %v307_v61 = vadd.f32 %v236_v52, %v122_v58 }
 0x1a0   :  { %v132_v62 = vadd.f32 0.00028619796, %v131_v59  ;;  %v143_v63 = vadd.f32 0.001143296, %v142_v60  ;;  %v310_v0 = vmul.f32 0.70710677, %v307_v61 }
 0x1a1   :  { %v125_v60 = vmul.f32 0.5, %v304_v54  ;;  %v126_v54 = vmul.f32 0.5, %v307_v61 }
 0x1a2   :  { %v133_v1 = vmul.f32 %v132_v62, %v130_v57  ;;  %v144_v2 = vmul.f32 %v143_v63, %v130_v57  ;;  %v169_v3 = vmul.f32 %v310_v0, %v310_v0 }
 0x1a4   :  { %v145_v4 = vadd.f32 0.014752088, %v144_v2  ;;  %v134_v5 = vadd.f32 0.0036580483, %v133_v1  ;;  %v170_v6 = vmin.f32 %v169_v3, 16.0 }
 0x1a6   :  { %v146_v7 = vmul.f32 %v145_v4, %v130_v57  ;;  %v171_v8 = vmul.f32 2.1237322e-06, %v170_v6  ;;  %v182_v9 = vmul.f32 3.8918573e-05, %v170_v6  ;;  %v135_v11 = vmul.f32 %v134_v5, %v130_v57 }
 0x1a8   :  { %v147_v10 = vadd.f32 0.112945676, %v146_v7  ;;  %v172_v12 = vadd.f32 0.00028619796, %v171_v8  ;;  %v183_v13 = vadd.f32 0.001143296, %v182_v9 }
 0x1a9   :  { %v136_v18 = vadd.f32 0.05243302, %v135_v11 }
 0x1aa   :  { %v148_v14 = vmul.f32 %v147_v10, %v130_v57  ;;  %v173_v15 = vmul.f32 %v172_v12, %v170_v6  ;;  %v184_v16 = vmul.f32 %v183_v13, %v170_v6 }
 0x1ab   :  { %v137_v24 = vmul.f32 %v136_v18, %v130_v57 }
 0x1ac   :  { %v149_v17 = vadd.f32 0.4994258, %v148_v14  ;;  %v185_v19 = vadd.f32 0.014752088, %v184_v16  ;;  %v174_v21 = vadd.f32 0.0036580483, %v173_v15 }
 0x1ad   :  { %v138_v28 = vadd.f32 0.18741608, %v137_v24 }
 0x1ae   :  { %v150_v20 = vmul.f32 %v149_v17, %v130_v57  ;;  %v186_v22 = vmul.f32 %v185_v19, %v170_v6  ;;  %v175_v26 = vmul.f32 %v174_v21, %v170_v6 }
 0x1af   :  { %v139_v33 = vmul.f32 %v138_v28, %v130_v57 }
 0x1b0   :  { %v151_v23 = vadd.f32 1.0, %v150_v20  ;;  %v187_v25 = vadd.f32 0.112945676, %v186_v22  ;;  %v176_v30 = vadd.f32 0.05243302, %v175_v26 }
 0x1b1   :  { %v140_v39 = vadd.f32 1.1283791, %v139_v33 }
 0x1b2   :  { %243 = vrcp.f32 %v151_v23  ;;  %v188_v27 = vmul.f32 %v187_v25, %v170_v6  ;;  %v177_v36 = vmul.f32 %v176_v30, %v170_v6  ;;  %v163_v38 = vand.u32 2147483648, %v151_v23 }
 0x1b3   :  { %v161_v41 = vand.u32 2147483647, %v151_v23  ;;  %vm157_vm9 = vweird.f32 %v151_v23  ;;  %v141_v46 = vmul.f32 %v140_v39, %v127_v55 }
 0x1b4   :  { %v189_v29 = vadd.f32 0.4994258, %v188_v27  ;;  %v178_v42 = vadd.f32 0.18741608, %v177_v36  ;;  %v164_v44 = vor.u32 1.1754944e-38, %v163_v38 }
 0x1b5   :  { %vm162_vm11 = vcmp.eq.f32.partialorder %v161_v41, 8.507059e+37 }
 0x1b6   :  { %v190_v31 = vmul.f32 %v189_v29, %v170_v6  ;;  %v179_v49 = vmul.f32 %v178_v42, %v170_v6 }
 0x1b8   :  { %v244_v32 = vpop.eup %243  ;;  %v191_v35 = vadd.f32 1.0, %v190_v31  ;;  %v180_v57 = vadd.f32 1.1283791, %v179_v49 }
 0x1b9   :  { %v153_v34 = vmul.f32 %v244_v32, %v151_v23  ;;  %vm158_vm8 = vweird.f32 %v244_v32 }
 0x1ba   :  { %245 = vrcp.f32 %v191_v35  ;;  %vm159_vm10 = vmor %vm157_vm9, %vm158_vm8  ;;  %v203_v56 = vand.u32 2147483648, %v191_v35  ;;  %v201_v59 = vand.u32 2147483647, %v191_v35  ;;  %vm197_vm14 = vweird.f32 %v191_v35 }
 0x1bb   :  { %v154_v37 = vsub.f32 1.0, %v153_v34  ;;  %v181_v2 = vmul.f32 %v180_v57, %v310_v0 }
 0x1bc   :  { %v204_v1 = vor.u32 1.1754944e-38, %v203_v56  ;;  %vm202_vm0 = vcmp.eq.f32.partialorder %v201_v59, 8.507059e+37 }
 0x1bd   :  { %v155_v40 = vmul.f32 %v244_v32, %v154_v37 }
 0x1bf   :  { %v156_v43 = vadd.f32 %v244_v32, %v155_v40 }
 0x1c0   :  { %v246_v45 = vpop.eup %245 }
 0x1c1   :  { %v160_v47 = vsel %vm159_vm10, %v244_v32, %v156_v43  ;;  %v193_v50 = vmul.f32 %v246_v45, %v191_v35  ;;  %vm198_vm12 = vweird.f32 %v246_v45 }
 0x1c2   :  { %v165_v48 = vsel %vm162_vm11, %v164_v44, %v160_v47  ;;  %vm199_vm15 = vmor %vm197_vm14, %vm198_vm12 }
 0x1c3   :  { %v166_v51 = vmul.f32 %v165_v48, %v141_v46  ;;  %v194_v52 = vsub.f32 1.0, %v193_v50 }
 0x1c5   :  { %v229_v53 = vclamps-f32 %v166_v51, 1.0  ;;  %v195_v58 = vmul.f32 %v246_v45, %v194_v52 }
 0x1c7   :  { %v209_v62 = vadd.f32 1.0, %v229_v53  ;;  %v196_v63 = vadd.f32 %v246_v45, %v195_v58 }
 0x1c9   :  { %v211_v55 = vmul.f32 %v209_v62, %v125_v60  ;;  %v200_v3 = vsel %vm199_vm15, %v246_v45, %v196_v63 }
 0x1ca   :  { %v205_v4 = vsel %vm202_vm0, %v204_v1, %v200_v3 }
 0x1cb   :  { %214 = vst.msk [vmem:[%s330_s5] sm:$0xff] %vm213_vm13, %v211_v55  ;;  %v206_v5 = vmul.f32 %v205_v4, %v181_v2 }
 0x1cd   :  { %v230_v6 = vclamps-f32 %v206_v5, 1.0 }
 0x1cf   :  { %v210_v7 = vadd.f32 1.0, %v230_v6 }
 0x1d1   :  { %v212_v8 = vmul.f32 %v210_v7, %v126_v54 }
 0x1d3   :  { %215 = vst.msk [vmem:[%s330_s5 + $0x8] sm:$0xff] %vm213_vm13, %v212_v8 }

// kernel: chemformer_forward.28
= control target key start
LH: loop header
LB: loop body
LE: loop exit
PB: predicated region body
PF: predicated region fallthrough
CT: control target
= control target key end

     0   :  { %vm23_vm0 = vcmask 261120   ;;  %v153_v4 = vmov 32.0   ;;  %vm125_vm8 = vcmask 785408   ;;  %s216_s0 = inlined_call_operand.vmem [shape: f32[16,32], index: 0, kind: input, shape index: {}]   ;;  %s217_s1 = inlined_call_operand.vmem [shape: f32[1,32], index: 1, kind: input, shape index: {}]   ;;  %s218_s2 = inlined_call_operand.vmem [shape: f32[1,32], index: 2, kind: input, shape index: {}]   ;;  %s219_s4 = inlined_call_operand.vmem [shape: f32[1,96], index: 4, kind: input, shape index: {}]   ;;  %s220_s3 = inlined_call_operand.vmem [shape: bf16[32,96], index: 3, kind: input, shape index: {}]   ;;  %s221_s5 = inlined_call_operand.vmem [shape: f32[16,96], index: 5, kind: output, shape index: {}]  }
   0x1   :  { %v21_v0 = vld [vmem:[%s216_s0] sm:$0xff]  ;;  %v22_v2 = vld [vmem:[%s216_s0 + $0x8] sm:$0xff]  ;;  %147 = vrcp.f32 %v153_v4 }
   0x2   :  { %v24_v1 = vsel %vm23_vm0, %v21_v0, 0.0  ;;  %v27_v3 = vsel %vm23_vm0, %v22_v2, 0.0  ;;  %v142_v21 = vld [vmem:[%s220_s3 + $0x8] sm:$0xff]  ;;  %v141_v23 = vld [vmem:[%s220_s3] sm:$0xff] }
   0x3   :  { %25 = vadd.xlane.f32.xlu0 %v24_v1  ;;  %117 = vmatpush.bf16.msra.mxu0 %v142_v21  ;;  %v144_v42 = vld [vmem:[%s217_s1] ss:$0 sm:$0xff] }
   0x4   :  { %v145_v47 = vld [vmem:[%s218_s2] ss:$0 sm:$0xff] }
   0x5   :  { %v146_v52 = vld [vmem:[%s219_s4] ss:$0 sm:$0xff] }
   0x7   :  { %v148_v5 = vpop.eup %147  ;;  %118 = vmatpush.bf16.msra.mxu0 %v141_v23 }
   0x8   :  { %v31_v6 = vmul.f32 32.0, %v148_v5  ;;  %vm35_vm1 = vweird.f32 %v148_v5 }
   0xa   :  { %v32_v7 = vsub.f32 1.0, %v31_v6 }
   0xb   :  { %28 = vadd.xlane.f32.xlu0 %v27_v3 }
   0xc   :  { %v33_v8 = vmul.f32 %v148_v5, %v32_v7 }
   0xe   :  { %v34_v9 = vadd.f32 %v148_v5, %v33_v8 }
  0x10   :  { %v36_v10 = vsel %vm35_vm1, %v148_v5, %v34_v9 }
  0x76   :  { %v26_v11 = vpop.xlane.xlu0 %25 }
  0x77   :  { %v37_v12 = vmul.f32 %v36_v10, %v26_v11 }
  0x79   :  { %v39_v13 = vsub.f32 %v21_v0, %v37_v12 }
  0x7b   :  { %v41_v14 = vmul.f32 %v39_v13, %v39_v13 }
  0x7d   :  { %v43_v15 = vsel %vm23_vm0, %v41_v14, 0.0 }
  0x7e   :  { %44 = vadd.xlane.f32.xlu1 %v43_v15  ;;  %v29_v16 = vpop.xlane.xlu0 %28 }
  0x7f   :  { %v38_v17 = vmul.f32 %v36_v10, %v29_v16 }
  0x81   :  { %v40_v18 = vsub.f32 %v22_v2, %v38_v17 }
  0x83   :  { %v42_v19 = vmul.f32 %v40_v18, %v40_v18 }
  0x85   :  { %v46_v20 = vsel %vm23_vm0, %v42_v19, 0.0 }
  0x86   :  { %47 = vadd.xlane.f32.xlu1 %v46_v20 }
  0xf1   :  { %v45_v22 = vpop.xlane.xlu1 %44 }
  0xf2   :  { %v49_v24 = vmul.f32 %v45_v22, %v36_v10 }
  0xf4   :  { %v51_v25 = vadd.f32 1e-05, %v49_v24 }
  0xf6   :  { %149 = vrsqrt.f32 %v51_v25  ;;  %vm59_vm3 = vweird.f32 %v51_v25 }
  0xf9   :  { %v48_v26 = vpop.xlane.xlu1 %47 }
  0xfa   :  { %v50_v27 = vmul.f32 %v48_v26, %v36_v10 }
  0xfc   :  { %v150_v28 = vpop.eup %149  ;;  %v52_v29 = vadd.f32 1e-05, %v50_v27 }
  0xfd   :  { %v54_v30 = vmul.f32 %v150_v28, %v51_v25  ;;  %vm60_vm2 = vweird.f32 %v150_v28 }
  0xfe   :  { %151 = vrsqrt.f32 %v52_v29  ;;  %vm61_vm4 = vmor %vm59_vm3, %vm60_vm2  ;;  %vm69_vm6 = vweird.f32 %v52_v29 }
  0xff   :  { %v55_v31 = vmul.f32 %v150_v28, %v54_v30 }
 0x101   :  { %v56_v32 = vmul.f32 0.5, %v55_v31 }
 0x103   :  { %v57_v33 = vsub.f32 1.5, %v56_v32 }
 0x104   :  { %v152_v34 = vpop.eup %151 }
 0x105   :  { %v58_v35 = vmul.f32 %v150_v28, %v57_v33  ;;  %v64_v36 = vmul.f32 %v152_v34, %v52_v29  ;;  %vm70_vm5 = vweird.f32 %v152_v34 }
 0x106   :  { %vm71_vm7 = vmor %vm69_vm6, %vm70_vm5 }
 0x107   :  { %v65_v37 = vmul.f32 %v152_v34, %v64_v36  ;;  %v62_v38 = vsel %vm61_vm4, %v150_v28, %v58_v35 }
 0x108   :  { %v73_v41 = vmul.f32 %v62_v38, %v39_v13 }
 0x109   :  { %v66_v39 = vmul.f32 0.5, %v65_v37 }
 0x10a   :  { %v79_v46 = vmul.f32 %v144_v42, %v73_v41 }
 0x10b   :  { %v67_v40 = vsub.f32 1.5, %v66_v39 }
 0x10c   :  { %v85_v49 = vadd.f32 %v145_v47, %v79_v46 }
 0x10d   :  { %v68_v43 = vmul.f32 %v152_v34, %v67_v40 }
 0x10f   :  { %v72_v44 = vsel %vm71_vm7, %v152_v34, %v68_v43 }
 0x110   :  { %v74_v45 = vmul.f32 %v72_v44, %v40_v18 }
 0x112   :  { %v80_v48 = vmul.f32 %v144_v42, %v74_v45 }
 0x114   :  { %v86_v50 = vadd.f32 %v145_v47, %v80_v48 }
 0x116   :  { %v87_v51 = vpack.c.bf16 %v86_v50, %v85_v49 }
 0x118   :  { %140 = vmatmul.msk.bf16.vlgmr.msra.gmra.mxu0 %vm23_vm0, %v87_v51 }
 0x195   :  { %v120_v53 = vpop.f32.mrf.mxu0 }
 0x196   :  { %v121_v54 = vadd.f32 %v146_v52, %v120_v53 }
 0x198   :  { %126 = vst.msk [vmem:[%s221_s5] sm:$0xff] %vm125_vm8, %v121_v54 }
 0x19d   :  { %v122_v55 = vpop.f32.mrf.mxu0 }
 0x19e   :  { %v123_v56 = vadd.f32 %v146_v52, %v122_v55 }
 0x1a0   :  { %127 = vst.msk [vmem:[%s221_s5 + $0x8] sm:$0xff] %vm125_vm8, %v123_v56 }

// kernel: chemformer_forward.29
= control target key start
LH: loop header
LB: loop body
LE: loop exit
PB: predicated region body
PF: predicated region fallthrough
CT: control target
= control target key end

     0   :  { %s571_s6 = smov 0   ;;  %s623_s0 = inlined_call_operand.vmem [shape: f32[2,8,96], index: 0, kind: input, shape index: {}]   ;;  %s624_s1 = inlined_call_operand.vmem [shape: f32[2,8,32], index: 1, kind: output, shape index: {}]  }
   0x1 LB: > { %s484_s7 = sadd.s32 4294967295, %s545_s6   ;;  %p488_p0 = scmp.ge.s32.totalorder %s545_s6, 1  ;;  %s545_s6 = sphi %s571_s6, %s11_s6  }
   0x2   : > { %p86_p1 = scmp.lt.s32.totalorder %s545_s6, 3 }
   0x4   : > { %p87_p2 = pnand %p488_p0, %p86_p1 }
   0x5   : > { %p104_p3 = scmp.lt.s32.totalorder (!%p87_p2), %s484_s7, 1  ;;  %s547_s12 = smov (!%p87_p2), 96  }
   0x6   : > { %90 = sbr.rel (%p87_p2) target bundleno = 919 (0x397), region = 24  ;;  %s548_s13 = smov (!%p87_p2), 88  }
   0x7   : > { %s549_s14 = smov (!%p87_p2), 120   ;;  %s550_s15 = smov (!%p87_p2), 72  }
   0x8   : > { %s551_s16 = smov (!%p87_p2), 104   ;;  %s552_s17 = smov (!%p87_p2), 64  }
   0x9   : > { %s553_s18 = smov (!%p87_p2), 80   ;;  %s554_s19 = smov (!%p87_p2), 112  }
   0xa   : > { %s555_s20 = smov (!%p87_p2), 56   ;;  %s556_s21 = smov (!%p87_p2), 40  }
   0xb   : > { %s626_s7 = smov (!%p104_p3, %s484_s7), 1  ;;  %vm120_vm0 = vcmask 64512   ;;  %vm155_vm1 = vcmask 1043456   ;;  %s557_s22 = smov 48  }
   0xc   : > { %s489_s8 = sshll.u32 %s626_s7, 3  ;;  %s558_s23 = smov 8  }
   0xd   : > { %s107_s11 = scalar_lea.vmem %s623_s0, %s489_s8  ;;  %s559_s24 = smov 24  }
   0xe   : > { %v113_v0 = vld [vmem:[%s107_s11] sm:$0xff]  ;;  %s560_s25 = smov 16   ;;  %s111_s28 = scalar_lea.vmem %s624_s1, %s489_s8 }
   0xf   : > { %v116_v1 = vpack.c.bf16 %v113_v0, %v113_v0  ;;  %v114_v2 = vmul.f32 0.35355338, %v113_v0 }
  0x11   : > { %118 = vrot.lane.b32.xlu0 %v116_v1, %s547_s12  ;;  %196 = vrot.lane.b32.xlu1 %v116_v1, %s548_s13  ;;  %v190_v3 = vpack.c.bf16 %v114_v2, %v114_v2 }
  0x12   : > { %150 = vrot.lane.b32.xlu2 %v116_v1, %s552_s17 }
  0x19   : > { %193 = vrot.lane.b32.xlu1 %v190_v3, %s549_s14 }
  0x1a   : > { %277 = vrot.lane.b32.xlu2 %v116_v1, %s553_s18 }
  0x21   : > { %358 = vrot.lane.b32.xlu1 %v116_v1, %s550_s15 }
  0x22   : > { %274 = vrot.lane.b32.xlu2 %v190_v3, %s554_s19 }
  0x29   : > { %355 = vrot.lane.b32.xlu1 %v190_v3, %s551_s16 }
  0x31   : > { %227 = vrot.lane.b32.xlu1 %v116_v1, %s555_s20 }
  0x6c   : > { %v151_v19 = vpop.permute.xlu2 %150 }
  0x6d   : > { %v157_v21 = vsel %vm155_vm1, %v151_v19, 0 }
  0x6e   : > { %166 = vmatpush.bf16.msra.mxu1 %v157_v21 }
  0x74   : > { %v278_v22 = vpop.permute.xlu2 %277 }
  0x75   : > { %v283_v24 = vsel %vm120_vm0, %v278_v22, 0 }
  0x76   : > { %292 = vmatpush.bf16.xpose.msrb.mxu1 %v283_v24 }
  0x7c   : > { %v275_v30 = vpop.permute.xlu2 %274 }
  0x83   : > { %v119_v4 = vpop.permute.xlu0 %118  ;;  %v197_v5 = vpop.permute.xlu1 %196 }
  0x84   : > { %v125_v6 = vsel %vm120_vm0, %v119_v4, 0  ;;  %v202_v7 = vsel %vm120_vm0, %v197_v5, 0 }
  0x85   : > { %134 = vmatpush.bf16.xpose.msra.mxu0 %v125_v6  ;;  %211 = vmatpush.bf16.xpose.msra.mxu2 %v202_v7 }
  0x8b   : > { %v194_v8 = vpop.permute.xlu1 %193 }
  0x8c   : > { %491 = vmatmul.msk.bf16.vlgmr.msra.gmra.mxu0 %vm120_vm0, %v190_v3  ;;  %493 = vmatmul.msk.bf16.vlgmr.msra.gmra.mxu2 %vm120_vm0, %v194_v8 }
  0x93   : > { %v359_v9 = vpop.permute.xlu1 %358 }
  0x94   : > { %v364_v10 = vsel %vm120_vm0, %v359_v9, 0 }
  0x95   : > { %373 = vmatpush.bf16.xpose.msrb.mxu0 %v364_v10 }
  0x9b   : > { %v356_v11 = vpop.permute.xlu1 %355 }
  0x9c   : > { %497 = vmatmul.msk.bf16.vlgmr.msrb.gmra.mxu0 %vm120_vm0, %v356_v11 }
  0xa3   : > { %v228_v35 = vpop.permute.xlu1 %227 }
  0xa4   : > { %v233_v36 = vsel %vm155_vm1, %v228_v35, 0 }
  0xa5   : > { %242 = vmatpush.bf16.msra.mxu3 %v233_v36 }
 0x109   : > { %v136_v12 = vpop.f32.mrf.mxu0 }
 0x10a   : > { %v140_v13 = vsel %vm120_vm0, %v136_v12, -inf }
 0x10b   : > { %141 = vmax.xlane.f32.xlu0 %v140_v13 }
 0x10f   : > { %v213_v14 = vpop.f32.mrf.mxu2 }
 0x110   : > { %v217_v15 = vsel %vm120_vm0, %v213_v14, -inf }
 0x111   : > { %v138_v16 = vpop.f32.mrf.mxu0  ;;  %218 = vmax.xlane.f32.xlu2 %v217_v15 }
 0x117   : > { %v215_v17 = vpop.f32.mrf.mxu2 }
 0x119   : > { %v375_v18 = vpop.f32.mrf.mxu0 }
 0x11a   : > { %v379_v20 = vsel %vm120_vm0, %v375_v18, -inf }
 0x11b   : > { %380 = vmax.xlane.f32.xlu0 %v379_v20 }
 0x121   : > { %v377_v23 = vpop.f32.mrf.mxu0 }
 0x129   : > { %389 = vrot.lane.b32.xlu2 %v116_v1, %s556_s21 }
 0x12f   : > { %308 = vrot.lane.b32.xlu0 %v116_v1, %s557_s22 }
 0x17e   : > { %v142_v25 = vpop.xlane.xlu0 %141 }
 0x17f   : > { %v143_v26 = vsub.f32 %v136_v12, %v142_v25 }
 0x181   : > { %v144_v27 = vmul.f32 1.442695, %v143_v26 }
 0x183   : > { %523 = vpow2.f32 %v144_v27 }
 0x184   : > { %v219_v31 = vpop.xlane.xlu2 %218 }
 0x185   : > { %v220_v32 = vsub.f32 %v213_v14, %v219_v31 }
 0x187   : > { %v221_v33 = vmul.f32 1.442695, %v220_v32 }
 0x189   : > { %v524_v28 = vpop.eup %523  ;;  %525 = vpow2.f32 %v221_v33 }
 0x18a   : > { %v149_v29 = vpack.c.bf16 %v524_v28, %v524_v28  ;;  %v146_v3 = vsel %vm120_vm0, %v524_v28, 0.0 }
 0x18c   : > { %492 = vmatmul.msk.bf16.vlgmr.msra.gmra.mxu1 %vm120_vm0, %v149_v29  ;;  %v390_v39 = vpop.permute.xlu2 %389 }
 0x18d   : > { %v395_v40 = vsel %vm155_vm1, %v390_v39, 0 }
 0x18e   : > { %404 = vmatpush.bf16.msrb.mxu2 %v395_v40  ;;  %v381_v41 = vpop.xlane.xlu0 %380 }
 0x18f   : > { %v526_v34 = vpop.eup %525  ;;  %v382_v42 = vsub.f32 %v375_v18, %v381_v41 }
 0x190   : > { %v223_v37 = vsel %vm120_vm0, %v526_v34, 0.0  ;;  %v226_v38 = vpack.c.bf16 %v526_v34, %v526_v34 }
 0x191   : > { %224 = vadd.xlane.f32.xlu0 %v223_v37  ;;  %v383_v43 = vmul.f32 1.442695, %v382_v42 }
 0x192   : > { %494 = vmatmul.msk.bf16.vlgmr.msra.gmra.mxu3 %vm120_vm0, %v226_v38 }
 0x193   : > { %527 = vpow2.f32 %v383_v43 }
 0x199   : > { %v528_v44 = vpop.eup %527 }
 0x19a   : > { %v385_v45 = vsel %vm120_vm0, %v528_v44, 0.0  ;;  %v388_v46 = vpack.c.bf16 %v528_v44, %v528_v44 }
 0x19b   : > { %386 = vadd.xlane.f32.xlu2 %v385_v45 }
 0x19c   : > { %495 = vmatmul.msk.bf16.vlgmr.msrb.gmra.mxu1 %vm120_vm0, %v275_v30  ;;  %498 = vmatmul.msk.bf16.vlgmr.msrb.gmra.mxu2 %vm120_vm0, %v388_v46 }
 0x1a1   : > { %v309_v53 = vpop.permute.xlu0 %308 }
 0x1a2   : > { %v314_v54 = vsel %vm155_vm1, %v309_v53, 0 }
 0x1a3   : > { %323 = vmatpush.bf16.msrb.mxu3 %v314_v54 }
 0x204   : > { %v225_v61 = vpop.xlane.xlu0 %224 }
 0x205   : > { %vm253_vm2 = vweird.f32 %v225_v61  ;;  %v259_v9 = vand.u32 2147483648, %v225_v61  ;;  %v257_v12 = vand.u32 2147483647, %v225_v61 }
 0x207   : > { %v260_v13 = vor.u32 1.1754944e-38, %v259_v9  ;;  %vm258_vm5 = vcmp.eq.f32.partialorder %v257_v12, 8.507059e+37 }
 0x209   : > { %v606_v47 = vpop.f32.mrf.mxu1 }
 0x20e   : > { %v387_v1 = vpop.xlane.xlu2 %386 }
 0x20f   : > { %vm415_vm6 = vweird.f32 %v387_v1  ;;  %v421_v16 = vand.u32 2147483648, %v387_v1  ;;  %v419_v19 = vand.u32 2147483647, %v387_v1 }
 0x211   : > { %v170_v48 = vpop.f32.mrf.mxu1  ;;  %v422_v21 = vor.u32 1.1754944e-38, %v421_v16  ;;  %vm420_vm9 = vcmp.eq.f32.partialorder %v419_v19, 8.507059e+37 }
 0x215   : > { %v244_v52 = vpop.f32.mrf.mxu3 }
 0x219   : > { %v294_v49 = vpop.f32.mrf.mxu1 }
 0x21a   : > { %v298_v50 = vsel %vm120_vm0, %v294_v49, -inf }
 0x21b   : > { %299 = vmax.xlane.f32.xlu1 %v298_v50 }
 0x21d   : > { %v246_v55 = vpop.f32.mrf.mxu3 }
 0x21f   : > { %v406_v56 = vpop.f32.mrf.mxu2 }
 0x221   : > { %v296_v51 = vpop.f32.mrf.mxu1 }
 0x227   : > { %v408_v57 = vpop.f32.mrf.mxu2 }
 0x28e   : > { %v300_v58 = vpop.xlane.xlu1 %299 }
 0x28f   : > { %v301_v59 = vsub.f32 %v294_v49, %v300_v58 }
 0x291   : > { %v302_v60 = vmul.f32 1.442695, %v301_v59 }
 0x293   : > { %529 = vpow2.f32 %v302_v60 }
 0x294   : > { %531 = vrcp.f32 %v225_v61 }
 0x295   : > { %533 = vrcp.f32 %v387_v1 }
 0x299   : > { %v530_v62 = vpop.eup %529 }
 0x29a   : > { %v304_v63 = vsel %vm120_vm0, %v530_v62, 0.0  ;;  %v307_v0 = vpack.c.bf16 %v530_v62, %v530_v62  ;;  %v532_v2 = vpop.eup %531 }
 0x29b   : > { %305 = vadd.xlane.f32.xlu1 %v304_v63  ;;  %v249_v4 = vmul.f32 %v532_v2, %v225_v61  ;;  %v534_v6 = vpop.eup %533  ;;  %vm254_vm3 = vweird.f32 %v532_v2 }
 0x29c   : > { %496 = vmatmul.msk.bf16.vlgmr.msrb.gmra.mxu3 %vm120_vm0, %v307_v0  ;;  %v411_v7 = vmul.f32 %v534_v6, %v387_v1  ;;  %vm255_vm4 = vmor %vm253_vm2, %vm254_vm3  ;;  %vm416_vm7 = vweird.f32 %v534_v6  ;;  %vm267_vm3 = vcmask 130112  }
 0x29d   : > { %v250_v5 = vsub.f32 1.0, %v249_v4  ;;  %vm417_vm8 = vmor %vm415_vm6, %vm416_vm7 }
 0x29e   : > { %v412_v10 = vsub.f32 1.0, %v411_v7 }
 0x29f   : > { %v251_v8 = vmul.f32 %v532_v2, %v250_v5 }
 0x2a0   : > { %v413_v14 = vmul.f32 %v534_v6, %v412_v10 }
 0x2a1   : > { %v252_v11 = vadd.f32 %v532_v2, %v251_v8 }
 0x2a2   : > { %v414_v18 = vadd.f32 %v534_v6, %v413_v14 }
 0x2a3   : > { %147 = vadd.xlane.f32.xlu1 %v146_v3  ;;  %v256_v15 = vsel %vm255_vm4, %v532_v2, %v252_v11  ;;  %vm348_vm4 = vcmask 195712  }
 0x2a4   : > { %v261_v17 = vsel %vm258_vm5, %v260_v13, %v256_v15  ;;  %v418_v22 = vsel %vm417_vm8, %v534_v6, %v414_v18  ;;  %vm429_vm5 = vcmask 261312  }
 0x2a5   : > { %v262_v20 = vmul.f32 %v261_v17, %v244_v52  ;;  %v423_v23 = vsel %vm420_vm9, %v422_v21, %v418_v22 }
 0x2a6   : > { %v424_v24 = vmul.f32 %v423_v23, %v406_v56 }
 0x2bc   : > { %264 = vrot.lane.b32.xlu1 %v262_v20, %s558_s23 }
 0x2c4   : > { %426 = vrot.lane.b32.xlu1 %v424_v24, %s559_s24 }
 0x30e   : > { %v306_v25 = vpop.xlane.xlu1 %305 }
 0x30f   : > { %535 = vrcp.f32 %v306_v25  ;;  %v340_v30 = vand.u32 2147483648, %v306_v25  ;;  %v338_v32 = vand.u32 2147483647, %v306_v25  ;;  %vm334_vm11 = vweird.f32 %v306_v25 }
 0x311   : > { %v341_v35 = vor.u32 1.1754944e-38, %v340_v30  ;;  %vm339_vm13 = vcmp.eq.f32.partialorder %v338_v32, 8.507059e+37 }
 0x315   : > { %v536_v26 = vpop.eup %535 }
 0x316   : > { %v330_v27 = vmul.f32 %v536_v26, %v306_v25  ;;  %v148_v28 = vpop.xlane.xlu1 %147  ;;  %vm335_vm10 = vweird.f32 %v536_v26 }
 0x317   : > { %537 = vrcp.f32 %v148_v28  ;;  %vm336_vm12 = vmor %vm334_vm11, %vm335_vm10  ;;  %v183_v42 = vand.u32 2147483648, %v148_v28  ;;  %v181_v44 = vand.u32 2147483647, %v148_v28  ;;  %vm177_vm15 = vweird.f32 %v148_v28 }
 0x318   : > { %v331_v29 = vsub.f32 1.0, %v330_v27 }
 0x319   : > { %v184_v46 = vor.u32 1.1754944e-38, %v183_v42  ;;  %vm182_vm2 = vcmp.eq.f32.partialorder %v181_v44, 8.507059e+37 }
 0x31a   : > { %v332_v31 = vmul.f32 %v536_v26, %v331_v29 }
 0x31c   : > { %v333_v33 = vadd.f32 %v536_v26, %v332_v31 }
 0x31d   : > { %v538_v34 = vpop.eup %537 }
 0x31e   : > { %v173_v36 = vmul.f32 %v538_v34, %v148_v28  ;;  %v337_v37 = vsel %vm336_vm12, %v536_v26, %v333_v33  ;;  %vm178_vm14 = vweird.f32 %v538_v34 }
 0x31f   : > { %v325_v38 = vpop.f32.mrf.mxu3  ;;  %v342_v39 = vsel %vm339_vm13, %v341_v35, %v337_v37  ;;  %vm179_vm1 = vmor %vm177_vm15, %vm178_vm14 }
 0x320   : > { %v174_v40 = vsub.f32 1.0, %v173_v36  ;;  %v343_v41 = vmul.f32 %v342_v39, %v325_v38 }
 0x322   : > { %v175_v43 = vmul.f32 %v538_v34, %v174_v40  ;;  %345 = vrot.lane.b32.xlu0 %v343_v41, %s560_s25 }
 0x324   : > { %v176_v45 = vadd.f32 %v538_v34, %v175_v43 }
 0x326   : > { %v180_v48 = vsel %vm179_vm1, %v538_v34, %v176_v45 }
 0x327   : > { %v185_v49 = vsel %vm182_vm2, %v184_v46, %v180_v48  ;;  %v327_v50 = vpop.f32.mrf.mxu3 }
 0x328   : > { %v186_v51 = vmul.f32 %v185_v49, %v606_v47 }
 0x32a   : > { %187 = vst.msk [vmem:[%s111_s28] sm:$0xff] %vm120_vm0, %v186_v51 }
 0x32e   : > { %v265_v52 = vpop.permute.xlu1 %264 }
 0x32f   : > { %268 = vst.msk [vmem:[%s111_s28] sm:$0xff] %vm267_vm3, %v265_v52 }
 0x336   : > { %v427_v54 = vpop.permute.xlu1 %426 }
 0x394   : > { %v346_v53 = vpop.permute.xlu0 %345 }
 0x395   : > { %349 = vst.msk [vmem:[%s111_s28] sm:$0xff] %vm348_vm4, %v346_v53 }
 0x396   : > { %430 = vst.msk [vmem:[%s111_s28] sm:$0xff] %vm429_vm5, %v427_v54 }
 0x397 PF: > { %s11_s6 = sadd.s32 1, %s545_s6  }
 0x398   : > { %p8_p4 = scmp.ge.s32.totalorder %s11_s6, 4  }
 0x39a   :  { %10 = sbr.rel (!%p8_p4) target bundleno = 1 (0x1), region = 54 }

// kernel: chemformer_forward.38
= control target key start
LH: loop header
LB: loop body
LE: loop exit
PB: predicated region body
PF: predicated region fallthrough
CT: control target
= control target key end

     0   :  { %vm38_vm0 = vcmask 261120   ;;  %s115_s1 = inlined_call_operand.vmem [shape: bf16[32,128], index: 1, kind: input, shape index: {}]   ;;  %s116_s0 = inlined_call_operand.vmem [shape: f32[16,32], index: 0, kind: input, shape index: {}]   ;;  %s117_s2 = inlined_call_operand.vmem [shape: f32[1,128], index: 2, kind: input, shape index: {}]   ;;  %s118_s3 = inlined_call_operand.vmem [shape: f32[16,128], index: 3, kind: output, shape index: {}]  }
   0x1   :  { %v72_v0 = vld [vmem:[%s115_s1 + $0x8] sm:$0xff]  ;;  %v71_v1 = vld [vmem:[%s115_s1] sm:$0xff] }
   0x2   :  { %48 = vmatpush.bf16.msra.mxu0 %v72_v0  ;;  %v15_v2 = vld [vmem:[%s116_s0] sm:$0xff]  ;;  %v16_v3 = vld [vmem:[%s116_s0 + $0x8] sm:$0xff] }
   0x3   :  { %v17_v4 = vpack.c.bf16 %v16_v3, %v15_v2  ;;  %v73_v5 = vld [vmem:[%s117_s2] ss:$0 sm:$0xff] }
   0x6   :  { %49 = vmatpush.bf16.msra.mxu0 %v71_v1 }
   0x9   :  { %70 = vmatmul.msk.bf16.vlgmr.msra.gmra.mxu0 %vm38_vm0, %v17_v4 }
  0x86   :  { %v51_v6 = vpop.f32.mrf.mxu0 }
  0x87   :  { %v52_v7 = vadd.f32 %v73_v5, %v51_v6 }
  0x89   :  { %56 = vst [vmem:[%s118_s3] sm:$0xff] %v52_v7 }
  0x8e   :  { %v53_v8 = vpop.f32.mrf.mxu0 }
  0x8f   :  { %v54_v9 = vadd.f32 %v73_v5, %v53_v8 }
  0x91   :  { %57 = vst [vmem:[%s118_s3 + $0x8] sm:$0xff] %v54_v9 }

// kernel: chemformer_forward.32
= control target key start
LH: loop header
LB: loop body
LE: loop exit
PB: predicated region body
PF: predicated region fallthrough
CT: control target
= control target key end

     0   :  { %vm57_vm0 = vcmask 523264   ;;  %vm79_vm1 = vcmask 261120   ;;  %s166_s1 = inlined_call_operand.vmem [shape: bf16[64,32], index: 1, kind: input, shape index: {}]   ;;  %s167_s2 = inlined_call_operand.vmem [shape: f32[1,32], index: 2, kind: input, shape index: {}]   ;;  %s168_s0 = inlined_call_operand.vmem [shape: f32[16,64], index: 0, kind: input, shape index: {}]   ;;  %s169_s3 = inlined_call_operand.vmem [shape: f32[16,32], index: 3, kind: input, shape index: {}]   ;;  %s170_s4 = inlined_call_operand.vmem [shape: f32[16,32], index: 4, kind: output, shape index: {}]  }
   0x1   :  { %v106_v0 = vld [vmem:[%s166_s1 + $0x18] sm:$0xff]  ;;  %v105_v1 = vld [vmem:[%s166_s1 + $0x10] sm:$0xff]  ;;  %v104_v2 = vld [vmem:[%s166_s1 + $0x8] sm:$0xff] }
   0x2   :  { %65 = vmatpush.bf16.msra.mxu0 %v106_v0  ;;  %v103_v3 = vld [vmem:[%s166_s1] sm:$0xff]  ;;  %v19_v5 = vld [vmem:[%s168_s0 + $0x8] sm:$0xff] }
   0x3   :  { %v18_v4 = vld [vmem:[%s168_s0] sm:$0xff]  ;;  %v76_v13 = vld [vmem:[%s169_s3 + $0x8] sm:$0xff] }
   0x4   :  { %v20_v6 = vpack.c.bf16 %v19_v5, %v18_v4  ;;  %v107_v7 = vld [vmem:[%s167_s2] ss:$0 sm:$0xff] }
   0x5   :  { %v75_v9 = vld [vmem:[%s169_s3] sm:$0xff] }
   0x6   :  { %66 = vmatpush.bf16.msra.mxu0 %v105_v1 }
   0xa   :  { %67 = vmatpush.bf16.msra.mxu0 %v104_v2 }
   0xe   :  { %68 = vmatpush.bf16.msra.mxu0 %v103_v3 }
  0x11   :  { %102 = vmatmul.msk.bf16.vlgmr.msra.gmra.mxu0 %vm57_vm0, %v20_v6 }
  0x8e   :  { %v70_v8 = vpop.f32.mrf.mxu0 }
  0x8f   :  { %v71_v10 = vadd.f32 %v107_v7, %v70_v8 }
  0x91   :  { %v77_v11 = vadd.f32 %v75_v9, %v71_v10 }
  0x93   :  { %80 = vst.msk [vmem:[%s170_s4] sm:$0xff] %vm79_vm1, %v77_v11 }
  0x96   :  { %v72_v12 = vpop.f32.mrf.mxu0 }
  0x97   :  { %v73_v14 = vadd.f32 %v107_v7, %v72_v12 }
  0x99   :  { %v78_v15 = vadd.f32 %v76_v13, %v73_v14 }
  0x9b   :  { %81 = vst.msk [vmem:[%s170_s4 + $0x8] sm:$0xff] %vm79_vm1, %v78_v15 }

// kernel: chemformer_forward.42
= control target key start
LH: loop header
LB: loop body
LE: loop exit
PB: predicated region body
PF: predicated region fallthrough
CT: control target
= control target key end

     0   :  { %vm23_vm0 = vcmask 261120   ;;  %v152_v4 = vmov 32.0   ;;  %s217_s0 = inlined_call_operand.vmem [shape: f32[16,32], index: 0, kind: input, shape index: {}]   ;;  %s218_s1 = inlined_call_operand.vmem [shape: f32[1,32], index: 1, kind: input, shape index: {}]   ;;  %s219_s2 = inlined_call_operand.vmem [shape: f32[1,32], index: 2, kind: input, shape index: {}]   ;;  %s220_s4 = inlined_call_operand.vmem [shape: f32[1,32], index: 4, kind: input, shape index: {}]   ;;  %s221_s3 = inlined_call_operand.vmem [shape: bf16[32,32], index: 3, kind: input, shape index: {}]   ;;  %s222_s5 = inlined_call_operand.vmem [shape: f32[16,32], index: 5, kind: output, shape index: {}]  }
   0x1   :  { %v21_v0 = vld [vmem:[%s217_s0] sm:$0xff]  ;;  %v22_v2 = vld [vmem:[%s217_s0 + $0x8] sm:$0xff]  ;;  %146 = vrcp.f32 %v152_v4 }
   0x2   :  { %v24_v1 = vsel %vm23_vm0, %v21_v0, 0.0  ;;  %v27_v3 = vsel %vm23_vm0, %v22_v2, 0.0  ;;  %v141_v21 = vld [vmem:[%s221_s3 + $0x8] sm:$0xff]  ;;  %v140_v23 = vld [vmem:[%s221_s3] sm:$0xff] }
   0x3   :  { %25 = vadd.xlane.f32.xlu0 %v24_v1  ;;  %117 = vmatpush.bf16.msra.mxu0 %v141_v21  ;;  %v143_v42 = vld [vmem:[%s218_s1] ss:$0 sm:$0xff] }
   0x4   :  { %v144_v47 = vld [vmem:[%s219_s2] ss:$0 sm:$0xff] }
   0x5   :  { %v145_v52 = vld [vmem:[%s220_s4] ss:$0 sm:$0xff] }
   0x7   :  { %v147_v5 = vpop.eup %146  ;;  %118 = vmatpush.bf16.msra.mxu0 %v140_v23 }
   0x8   :  { %v31_v6 = vmul.f32 32.0, %v147_v5  ;;  %vm35_vm1 = vweird.f32 %v147_v5 }
   0xa   :  { %v32_v7 = vsub.f32 1.0, %v31_v6 }
   0xb   :  { %28 = vadd.xlane.f32.xlu0 %v27_v3 }
   0xc   :  { %v33_v8 = vmul.f32 %v147_v5, %v32_v7 }
   0xe   :  { %v34_v9 = vadd.f32 %v147_v5, %v33_v8 }
  0x10   :  { %v36_v10 = vsel %vm35_vm1, %v147_v5, %v34_v9 }
  0x76   :  { %v26_v11 = vpop.xlane.xlu0 %25 }
  0x77   :  { %v37_v12 = vmul.f32 %v36_v10, %v26_v11 }
  0x79   :  { %v39_v13 = vsub.f32 %v21_v0, %v37_v12 }
  0x7b   :  { %v41_v14 = vmul.f32 %v39_v13, %v39_v13 }
  0x7d   :  { %v43_v15 = vsel %vm23_vm0, %v41_v14, 0.0 }
  0x7e   :  { %44 = vadd.xlane.f32.xlu1 %v43_v15  ;;  %v29_v16 = vpop.xlane.xlu0 %28 }
  0x7f   :  { %v38_v17 = vmul.f32 %v36_v10, %v29_v16 }
  0x81   :  { %v40_v18 = vsub.f32 %v22_v2, %v38_v17 }
  0x83   :  { %v42_v19 = vmul.f32 %v40_v18, %v40_v18 }
  0x85   :  { %v46_v20 = vsel %vm23_vm0, %v42_v19, 0.0 }
  0x86   :  { %47 = vadd.xlane.f32.xlu1 %v46_v20 }
  0xf1   :  { %v45_v22 = vpop.xlane.xlu1 %44 }
  0xf2   :  { %v49_v24 = vmul.f32 %v45_v22, %v36_v10 }
  0xf4   :  { %v51_v25 = vadd.f32 1e-05, %v49_v24 }
  0xf6   :  { %148 = vrsqrt.f32 %v51_v25  ;;  %vm59_vm3 = vweird.f32 %v51_v25 }
  0xf9   :  { %v48_v26 = vpop.xlane.xlu1 %47 }
  0xfa   :  { %v50_v27 = vmul.f32 %v48_v26, %v36_v10 }
  0xfc   :  { %v149_v28 = vpop.eup %148  ;;  %v52_v29 = vadd.f32 1e-05, %v50_v27 }
  0xfd   :  { %v54_v30 = vmul.f32 %v149_v28, %v51_v25  ;;  %vm60_vm2 = vweird.f32 %v149_v28 }
  0xfe   :  { %150 = vrsqrt.f32 %v52_v29  ;;  %vm61_vm4 = vmor %vm59_vm3, %vm60_vm2  ;;  %vm69_vm6 = vweird.f32 %v52_v29 }
  0xff   :  { %v55_v31 = vmul.f32 %v149_v28, %v54_v30 }
 0x101   :  { %v56_v32 = vmul.f32 0.5, %v55_v31 }
 0x103   :  { %v57_v33 = vsub.f32 1.5, %v56_v32 }
 0x104   :  { %v151_v34 = vpop.eup %150 }
 0x105   :  { %v58_v35 = vmul.f32 %v149_v28, %v57_v33  ;;  %v64_v36 = vmul.f32 %v151_v34, %v52_v29  ;;  %vm70_vm5 = vweird.f32 %v151_v34 }
 0x106   :  { %vm71_vm7 = vmor %vm69_vm6, %vm70_vm5 }
 0x107   :  { %v65_v37 = vmul.f32 %v151_v34, %v64_v36  ;;  %v62_v38 = vsel %vm61_vm4, %v149_v28, %v58_v35 }
 0x108   :  { %v73_v41 = vmul.f32 %v62_v38, %v39_v13 }
 0x109   :  { %v66_v39 = vmul.f32 0.5, %v65_v37 }
 0x10a   :  { %v79_v46 = vmul.f32 %v143_v42, %v73_v41 }
 0x10b   :  { %v67_v40 = vsub.f32 1.5, %v66_v39 }
 0x10c   :  { %v85_v49 = vadd.f32 %v144_v47, %v79_v46 }
 0x10d   :  { %v68_v43 = vmul.f32 %v151_v34, %v67_v40 }
 0x10f   :  { %v72_v44 = vsel %vm71_vm7, %v151_v34, %v68_v43 }
 0x110   :  { %v74_v45 = vmul.f32 %v72_v44, %v40_v18 }
 0x112   :  { %v80_v48 = vmul.f32 %v143_v42, %v74_v45 }
 0x114   :  { %v86_v50 = vadd.f32 %v144_v47, %v80_v48 }
 0x116   :  { %v87_v51 = vpack.c.bf16 %v86_v50, %v85_v49 }
 0x118   :  { %139 = vmatmul.msk.bf16.vlgmr.msra.gmra.mxu0 %vm23_vm0, %v87_v51 }
 0x195   :  { %v120_v53 = vpop.f32.mrf.mxu0 }
 0x196   :  { %v121_v54 = vadd.f32 %v145_v52, %v120_v53 }
 0x198   :  { %125 = vst.msk [vmem:[%s222_s5] sm:$0xff] %vm23_vm0, %v121_v54 }
 0x19d   :  { %v122_v55 = vpop.f32.mrf.mxu0 }
 0x19e   :  { %v123_v56 = vadd.f32 %v145_v52, %v122_v55 }
 0x1a0   :  { %126 = vst.msk [vmem:[%s222_s5 + $0x8] sm:$0xff] %vm23_vm0, %v123_v56 }

// kernel: chemformer_forward.43
= control target key start
LH: loop header
LB: loop body
LE: loop exit
PB: predicated region body
PF: predicated region fallthrough
CT: control target
= control target key end

     0   :  { %s627_s9 = smov 0   ;;  %s696_s0 = inlined_call_operand.vmem [shape: f32[2,8,32], index: 0, kind: input, shape index: {}]   ;;  %s697_s1 = inlined_call_operand.vmem [shape: f32[2,8,64], index: 1, kind: input, shape index: {}]   ;;  %s698_s2 = inlined_call_operand.vmem [shape: f32[2,8,32], index: 2, kind: output, shape index: {}]  }
   0x1 LB: > { %s542_s10 = sadd.s32 4294967295, %s600_s9   ;;  %p546_p0 = scmp.ge.s32.totalorder %s600_s9, 1  ;;  %s600_s9 = sphi %s627_s9, %s12_s9  }
   0x2   : > { %p120_p1 = scmp.lt.s32.totalorder %s600_s9, 3 }
   0x4   : > { %p121_p2 = pnand %p546_p0, %p120_p1 }
   0x5   : > { %p144_p3 = scmp.lt.s32.totalorder (!%p121_p2), %s542_s10, 1  ;;  %s602_s18 = smov (!%p121_p2), 112  }
   0x6   : > { %124 = sbr.rel (%p121_p2) target bundleno = 823 (0x337), region = 28  ;;  %s603_s19 = smov (!%p121_p2), 104  }
   0x7   : > { %s604_s20 = smov (!%p121_p2), 120   ;;  %s605_s21 = smov (!%p121_p2), 96  }
   0x8   : > { %s606_s22 = smov (!%p121_p2), 88   ;;  %s607_s23 = smov (!%p121_p2), 72  }
   0x9   : > { %s608_s24 = smov (!%p121_p2), 80   ;;  %s609_s28 = smov (!%p121_p2), 8  }
   0xa   : > { %s610_s29 = smov (!%p121_p2), 16   ;;  %s611_s30 = smov (!%p121_p2), 24  }
   0xb   : > { %s700_s10 = smov (!%p144_p3, %s542_s10), 1  ;;  %vm162_vm0 = vcmask 64512   ;;  %vm198_vm1 = vcmask 1043456  }
   0xc   : > { %s635_s11 = sshll.u32 %s700_s10, 3 }
   0xd   : > { %s151_s14 = scalar_lea.vmem %s697_s1, %s635_s11  ;;  %s147_s17 = scalar_lea.vmem %s696_s0, %s635_s11 }
   0xe   : > { %v159_v0 = vld [vmem:[%s151_s14] sm:$0xff]  ;;  %s685_s27 = scalar_lea.vmem %s698_s2, %s635_s11 }
   0xf   : > { %v157_v1 = vld [vmem:[%s147_s17] sm:$0xff]  ;;  %v645_v2 = vpack.c.bf16 %v159_v0, %v159_v0 }
  0x10   : > { %v158_v4 = vmul.f32 0.35355338, %v157_v1 }
  0x11   : > { %v167_v3 = vsel %vm162_vm0, %v645_v2, 0  ;;  %322 = vrot.lane.b32.xlu2 %v645_v2, %s602_s18 }
  0x12   : > { %176 = vmatpush.bf16.xpose.msra.mxu0 %v167_v3  ;;  %v160_v5 = vpack.c.bf16 %v158_v4, %v158_v4 }
  0x14   : > { %237 = vrot.lane.b32.xlu1 %v160_v5, %s604_s20 }
  0x19   : > { %550 = vmatmul.msk.bf16.vlgmr.msra.gmra.mxu0 %vm162_vm0, %v160_v5  ;;  %404 = vrot.lane.b32.xlu2 %v645_v2, %s603_s19 }
  0x1c   : > { %193 = vrot.lane.b32.xlu1 %v645_v2, %s605_s21 }
  0x21   : > { %401 = vrot.lane.b32.xlu2 %v160_v5, %s603_s19 }
  0x24   : > { %319 = vrot.lane.b32.xlu1 %v160_v5, %s602_s18 }
  0x29   : > { %271 = vrot.lane.b32.xlu2 %v645_v2, %s606_s22 }
  0x6b   : > { %v323_v6 = vpop.permute.xlu2 %322 }
  0x6c   : > { %v328_v16 = vsel %vm162_vm0, %v323_v6, 0 }
  0x73   : > { %v405_v7 = vpop.permute.xlu2 %404 }
  0x74   : > { %v410_v8 = vsel %vm162_vm0, %v405_v7, 0 }
  0x75   : > { %419 = vmatpush.bf16.xpose.msrb.mxu0 %v410_v8 }
  0x7b   : > { %v402_v11 = vpop.permute.xlu2 %401 }
  0x7c   : > { %556 = vmatmul.msk.bf16.vlgmr.msrb.gmra.mxu0 %vm162_vm0, %v402_v11 }
  0x83   : > { %v272_v36 = vpop.permute.xlu2 %271 }
  0x84   : > { %v277_v37 = vsel %vm198_vm1, %v272_v36, 0 }
  0x85   : > { %286 = vmatpush.bf16.msra.mxu3 %v277_v37 }
  0x86   : > { %v238_v13 = vpop.permute.xlu1 %237 }
  0x8e   : > { %v194_v14 = vpop.permute.xlu1 %193 }
  0x8f   : > { %v200_v15 = vsel %vm198_vm1, %v194_v14, 0 }
  0x90   : > { %209 = vmatpush.bf16.msra.mxu1 %v200_v15 }
  0x94   : > { %337 = vmatpush.bf16.xpose.msrb.mxu1 %v328_v16 }
  0x96   : > { %v178_v9 = vpop.f32.mrf.mxu0  ;;  %v320_v27 = vpop.permute.xlu1 %319 }
  0x97   : > { %v182_v10 = vsel %vm162_vm0, %v178_v9, -inf }
  0x98   : > { %183 = vmax.xlane.f32.xlu0 %v182_v10 }
  0x9e   : > { %v180_v12 = vpop.f32.mrf.mxu0 }
  0xac   : > { %240 = vrot.lane.b32.xlu0 %v645_v2, %s604_s20 }
  0xf9   : > { %v421_v22 = vpop.f32.mrf.mxu0 }
  0xfa   : > { %v425_v23 = vsel %vm162_vm0, %v421_v22, -inf }
  0xfb   : > { %426 = vmax.xlane.f32.xlu2 %v425_v23 }
 0x101   : > { %v423_v26 = vpop.f32.mrf.mxu0 }
 0x10b   : > { %v184_v17 = vpop.xlane.xlu0 %183 }
 0x10c   : > { %v185_v18 = vsub.f32 %v178_v9, %v184_v17 }
 0x10e   : > { %v186_v19 = vmul.f32 1.442695, %v185_v18 }
 0x110   : > { %578 = vpow2.f32 %v186_v19 }
 0x116   : > { %v579_v20 = vpop.eup %578 }
 0x117   : > { %v191_v21 = vpack.c.bf16 %v579_v20, %v579_v20  ;;  %v188_v38 = vsel %vm162_vm0, %v579_v20, 0.0 }
 0x119   : > { %551 = vmatmul.msk.bf16.vlgmr.msra.gmra.mxu1 %vm162_vm0, %v191_v21 }
 0x11e   : > { %v241_v24 = vpop.permute.xlu0 %240 }
 0x11f   : > { %v246_v25 = vsel %vm162_vm0, %v241_v24, 0 }
 0x120   : > { %255 = vmatpush.bf16.xpose.msra.mxu2 %v246_v25 }
 0x127   : > { %552 = vmatmul.msk.bf16.vlgmr.msra.gmra.mxu2 %vm162_vm0, %v238_v13 }
 0x129   : > { %554 = vmatmul.msk.bf16.vlgmr.msrb.gmra.mxu1 %vm162_vm0, %v320_v27 }
 0x16e   : > { %v427_v39 = vpop.xlane.xlu2 %426 }
 0x16f   : > { %v428_v42 = vsub.f32 %v421_v22, %v427_v39 }
 0x171   : > { %v429_v46 = vmul.f32 1.442695, %v428_v42 }
 0x196   : > { %v665_v28 = vpop.f32.mrf.mxu1 }
 0x19e   : > { %v213_v29 = vpop.f32.mrf.mxu1 }
 0x1a6   : > { %v339_v30 = vpop.f32.mrf.mxu1 }
 0x1a7   : > { %v343_v31 = vsel %vm162_vm0, %v339_v30, -inf }
 0x1a8   : > { %344 = vmax.xlane.f32.xlu0 %v343_v31 }
 0x1aa   : > { %v257_v32 = vpop.f32.mrf.mxu2 }
 0x1ab   : > { %v261_v33 = vsel %vm162_vm0, %v257_v32, -inf }
 0x1ac   : > { %262 = vmax.xlane.f32.xlu1 %v261_v33 }
 0x1ae   : > { %v341_v34 = vpop.f32.mrf.mxu1 }
 0x1b2   : > { %v259_v35 = vpop.f32.mrf.mxu2 }
 0x1bc   : > { %435 = vrot.lane.b32.xlu0 %v645_v2, %s607_s23 }
 0x1c5   : > { %353 = vrot.lane.b32.xlu1 %v645_v2, %s608_s24 }
 0x1e6   : > { %189 = vadd.xlane.f32.xlu0 %v188_v38 }
 0x21b   : > { %v345_v40 = vpop.xlane.xlu0 %344 }
 0x21c   : > { %v346_v44 = vsub.f32 %v339_v30, %v345_v40 }
 0x21e   : > { %v347_v47 = vmul.f32 1.442695, %v346_v44 }
 0x21f   : > { %v263_v41 = vpop.xlane.xlu1 %262 }
 0x220   : > { %v264_v43 = vsub.f32 %v257_v32, %v263_v41 }
 0x222   : > { %v265_v45 = vmul.f32 1.442695, %v264_v43 }
 0x224   : > { %580 = vpow2.f32 %v265_v45 }
 0x225   : > { %582 = vpow2.f32 %v429_v46 }
 0x226   : > { %584 = vpow2.f32 %v347_v47 }
 0x22a   : > { %v581_v48 = vpop.eup %580 }
 0x22b   : > { %v267_v49 = vsel %vm162_vm0, %v581_v48, 0.0  ;;  %v270_v50 = vpack.c.bf16 %v581_v48, %v581_v48  ;;  %v583_v51 = vpop.eup %582 }
 0x22c   : > { %268 = vadd.xlane.f32.xlu2 %v267_v49  ;;  %v585_v54 = vpop.eup %584  ;;  %v434_v55 = vpack.c.bf16 %v583_v51, %v583_v51  ;;  %v431_v59 = vsel %vm162_vm0, %v583_v51, 0.0 }
 0x22d   : > { %553 = vmatmul.msk.bf16.vlgmr.msra.gmra.mxu3 %vm162_vm0, %v270_v50  ;;  %v349_v56 = vsel %vm162_vm0, %v585_v54, 0.0  ;;  %v352_v60 = vpack.c.bf16 %v585_v54, %v585_v54 }
 0x22e   : > { %v436_v52 = vpop.permute.xlu0 %435 }
 0x22f   : > { %v441_v53 = vsel %vm198_vm1, %v436_v52, 0 }
 0x230   : > { %450 = vmatpush.bf16.msrb.mxu2 %v441_v53 }
 0x233   : > { %557 = vmatmul.msk.bf16.vlgmr.msrb.gmra.mxu2 %vm162_vm0, %v434_v55 }
 0x234   : > { %350 = vadd.xlane.f32.xlu2 %v349_v56 }
 0x237   : > { %v354_v57 = vpop.permute.xlu1 %353 }
 0x238   : > { %v359_v58 = vsel %vm198_vm1, %v354_v57, 0 }
 0x239   : > { %368 = vmatpush.bf16.msrb.mxu3 %v359_v58 }
 0x23c   : > { %432 = vadd.xlane.f32.xlu2 %v431_v59 }
 0x23d   : > { %555 = vmatmul.msk.bf16.vlgmr.msrb.gmra.mxu3 %vm162_vm0, %v352_v60 }
 0x259   : > { %v190_v61 = vpop.xlane.xlu0 %189 }
 0x25a   : > { %586 = vrcp.f32 %v190_v61  ;;  %v226_v1 = vand.u32 2147483648, %v190_v61  ;;  %v224_v3 = vand.u32 2147483647, %v190_v61  ;;  %vm220_vm3 = vweird.f32 %v190_v61 }
 0x25c   : > { %v227_v5 = vor.u32 1.1754944e-38, %v226_v1  ;;  %vm225_vm5 = vcmp.eq.f32.partialorder %v224_v3, 8.507059e+37 }
 0x260   : > { %v587_v62 = vpop.eup %586 }
 0x261   : > { %v216_v63 = vmul.f32 %v587_v62, %v190_v61  ;;  %vm221_vm2 = vweird.f32 %v587_v62 }
 0x262   : > { %vm222_vm4 = vmor %vm220_vm3, %vm221_vm2  ;;  %vm311_vm2 = vcmask 130112   ;;  %vm393_vm3 = vcmask 195712  }
 0x263   : > { %v217_v0 = vsub.f32 1.0, %v216_v63 }
 0x265   : > { %v218_v2 = vmul.f32 %v587_v62, %v217_v0 }
 0x267   : > { %v219_v4 = vadd.f32 %v587_v62, %v218_v2 }
 0x269   : > { %v223_v6 = vsel %vm222_vm4, %v587_v62, %v219_v4  ;;  %vm475_vm4 = vcmask 261312  }
 0x26a   : > { %v228_v7 = vsel %vm225_vm5, %v227_v5, %v223_v6 }
 0x26b   : > { %v229_v8 = vmul.f32 %v228_v7, %v665_v28 }
 0x26d   : > { %230 = vst.msk [vmem:[%s685_s27] sm:$0xff] %vm162_vm0, %v229_v8 }
 0x29f   : > { %v269_v9 = vpop.xlane.xlu2 %268 }
 0x2a0   : > { %588 = vrcp.f32 %v269_v9  ;;  %v303_v14 = vand.u32 2147483648, %v269_v9  ;;  %v301_v16 = vand.u32 2147483647, %v269_v9  ;;  %vm297_vm7 = vweird.f32 %v269_v9 }
 0x2a2   : > { %v304_v19 = vor.u32 1.1754944e-38, %v303_v14  ;;  %vm302_vm9 = vcmp.eq.f32.partialorder %v301_v16, 8.507059e+37 }
 0x2a6   : > { %v589_v10 = vpop.eup %588 }
 0x2a7   : > { %v293_v11 = vmul.f32 %v589_v10, %v269_v9  ;;  %v351_v12 = vpop.xlane.xlu2 %350  ;;  %vm298_vm6 = vweird.f32 %v589_v10 }
 0x2a8   : > { %590 = vrcp.f32 %v351_v12  ;;  %vm299_vm8 = vmor %vm297_vm7, %vm298_vm6  ;;  %vm379_vm11 = vweird.f32 %v351_v12  ;;  %v385_v35 = vand.u32 2147483648, %v351_v12  ;;  %v383_v38 = vand.u32 2147483647, %v351_v12 }
 0x2a9   : > { %v294_v13 = vsub.f32 1.0, %v293_v11 }
 0x2aa   : > { %v386_v43 = vor.u32 1.1754944e-38, %v385_v35  ;;  %vm384_vm1 = vcmp.eq.f32.partialorder %v383_v38, 8.507059e+37 }
 0x2ab   : > { %v295_v15 = vmul.f32 %v589_v10, %v294_v13 }
 0x2ad   : > { %v296_v17 = vadd.f32 %v589_v10, %v295_v15 }
 0x2ae   : > { %v591_v18 = vpop.eup %590 }
 0x2af   : > { %v375_v20 = vmul.f32 %v591_v18, %v351_v12  ;;  %v433_v21 = vpop.xlane.xlu2 %432  ;;  %v300_v22 = vsel %vm299_vm8, %v589_v10, %v296_v17  ;;  %vm380_vm10 = vweird.f32 %v591_v18 }
 0x2b0   : > { %592 = vrcp.f32 %v433_v21  ;;  %v288_v23 = vpop.f32.mrf.mxu3  ;;  %v305_v24 = vsel %vm302_vm9, %v304_v19, %v300_v22  ;;  %v467_v34 = vand.u32 2147483648, %v433_v21  ;;  %v465_v37 = vand.u32 2147483647, %v433_v21  ;;  %vm381_vm13 = vmor %vm379_vm11, %vm380_vm10 }
 0x2b1   : > { %v376_v25 = vsub.f32 1.0, %v375_v20  ;;  %v306_v26 = vmul.f32 %v305_v24, %v288_v23  ;;  %vm461_vm14 = vweird.f32 %v433_v21 }
 0x2b2   : > { %v468_v41 = vor.u32 1.1754944e-38, %v467_v34  ;;  %vm466_vm0 = vcmp.eq.f32.partialorder %v465_v37, 8.507059e+37 }
 0x2b3   : > { %308 = vrot.lane.b32.xlu1 %v306_v26, %s609_s28  ;;  %v377_v27 = vmul.f32 %v591_v18, %v376_v25 }
 0x2b5   : > { %v378_v33 = vadd.f32 %v591_v18, %v377_v27 }
 0x2b6   : > { %v593_v28 = vpop.eup %592  ;;  %v452_v29 = vpop.f32.mrf.mxu2 }
 0x2b7   : > { %v457_v30 = vmul.f32 %v593_v28, %v433_v21  ;;  %vm462_vm12 = vweird.f32 %v593_v28  ;;  %v382_v40 = vsel %vm381_vm13, %v591_v18, %v378_v33 }
 0x2b8   : > { %v290_v31 = vpop.f32.mrf.mxu3  ;;  %vm463_vm15 = vmor %vm461_vm14, %vm462_vm12  ;;  %v387_v47 = vsel %vm384_vm1, %v386_v43, %v382_v40 }
 0x2b9   : > { %v458_v32 = vsub.f32 1.0, %v457_v30 }
 0x2bb   : > { %v459_v36 = vmul.f32 %v593_v28, %v458_v32 }
 0x2bd   : > { %v460_v39 = vadd.f32 %v593_v28, %v459_v36 }
 0x2be   : > { %v454_v42 = vpop.f32.mrf.mxu2 }
 0x2bf   : > { %v464_v44 = vsel %vm463_vm15, %v593_v28, %v460_v39 }
 0x2c0   : > { %v469_v45 = vsel %vm466_vm0, %v468_v41, %v464_v44  ;;  %v370_v46 = vpop.f32.mrf.mxu3 }
 0x2c1   : > { %v470_v48 = vmul.f32 %v469_v45, %v452_v29  ;;  %v388_v49 = vmul.f32 %v387_v47, %v370_v46 }
 0x2c3   : > { %390 = vrot.lane.b32.xlu2 %v388_v49, %s610_s29  ;;  %472 = vrot.lane.b32.xlu1 %v470_v48, %s611_s30 }
 0x2c8   : > { %v372_v50 = vpop.f32.mrf.mxu3 }
 0x31d   : > { %v391_v52 = vpop.permute.xlu2 %390 }
 0x325   : > { %v309_v51 = vpop.permute.xlu1 %308 }
 0x326   : > { %312 = vst.msk [vmem:[%s685_s27] sm:$0xff] %vm311_vm2, %v309_v51 }
 0x327   : > { %394 = vst.msk [vmem:[%s685_s27] sm:$0xff] %vm393_vm3, %v391_v52 }
 0x335   : > { %v473_v53 = vpop.permute.xlu1 %472 }
 0x336   : > { %476 = vst.msk [vmem:[%s685_s27] sm:$0xff] %vm475_vm4, %v473_v53 }
 0x337 PF: > { %s12_s9 = sadd.s32 1, %s600_s9  }
 0x338   : > { %p9_p4 = scmp.ge.s32.totalorder %s12_s9, 4  }
 0x33a   :  { %11 = sbr.rel (!%p9_p4) target bundleno = 1 (0x1), region = 61 }

</bundles_post_ra>
